<compile_context>
chip_gen: v5e
topology: v5e:2x2
jax: 0.10.0
libtpu: 0.0.40
codegen_flags: <defaults>
</compile_context>

<pallas_src>
import math
import jax
import jax.numpy as jnp
from jax.experimental import pallas as pl
from jax.experimental.pallas import tpu as pltpu  # noqa: F401  (TPU backend)

# ----------------------- small synthetic BERT config -----------------------
VOCAB = 64
TYPE_VOCAB = 2
MAX_POS = 16
B = 2          # batch
S = 8          # sequence length
H = 32         # hidden size
NH = 4         # attention heads
HD = H // NH   # head dim
FF = 64        # FFN intermediate size
NLAYERS = 2
LN_EPS = 1e-12
LANE = 128     # lane-dense output width


# ------------------------------ kernel helpers ------------------------------
def _layer_norm(x, gamma, beta):
    mean = jnp.mean(x, axis=-1, keepdims=True)
    var = jnp.mean((x - mean) ** 2, axis=-1, keepdims=True)
    return (x - mean) * jax.lax.rsqrt(var + LN_EPS) * gamma + beta


# ------------------------------- fused kernel -------------------------------
def fused_bert_qa_kernel(emb_ref, mask_ref, emb_ln_g_ref, emb_ln_b_ref,
                         wqkv_ref, bqkv_ref, wo_ref, bo_ref,
                         ln1_g_ref, ln1_b_ref, w1_ref, b1_ref,
                         w2_ref, b2_ref, ln2_g_ref, ln2_b_ref,
                         qa_w_ref, qa_b_ref, hs_ref, logits_ref):
    # ---- hoisted loop invariants ----
    mask = mask_ref[...]                                    # (NH*B, 1, S), additive
    lane_pad = jnp.zeros((B * S, LANE - H), jnp.float32)    # for lane-dense hs stores

    # ---- embeddings LayerNorm (whole batch, (B*S, H)) ----
    h = _layer_norm(emb_ref[...], emb_ln_g_ref[...], emb_ln_b_ref[...])
    hs_ref[0] = jnp.concatenate([h, lane_pad], axis=-1)     # full 128-lane store

    # ---- encoder layers (NLAYERS=2: static unroll over stacked weights) ----
    for l in range(NLAYERS):
        # fused QKV projection: ONE MXU matmul (bf16 operands, f32 accumulate);
        # 1/sqrt(HD) is pre-folded into the q columns of w_qkv / b_qkv.
        qkv = (jnp.dot(h.astype(jnp.bfloat16), wqkv_ref[l],
                       preferred_element_type=jnp.float32) + bqkv_ref[l])
        qkv = qkv.astype(jnp.bfloat16).reshape(B, S, 3 * H)

        # head-major batched layout (NH*B, S, HD): lane-slice per head, stack
        # along the (untiled) leading axis — no transposes, no .T.
        def heads(base):
            return jnp.concatenate(
                [qkv[:, :, base + n * HD: base + (n + 1) * HD] for n in range(NH)],
                axis=0)
        q_nb, k_nb, v_nb = heads(0), heads(H), heads(2 * H)

        # single batched score matmul + ONE softmax chain for all (b, head)
        s = jnp.einsum('bqd,bkd->bqk', q_nb, k_nb,
                       preferred_element_type=jnp.float32) + mask   # (NH*B,S,S)
        m = jnp.max(s, axis=-1, keepdims=True)
        e = jnp.exp(s - m)
        p = e / jnp.sum(e, axis=-1, keepdims=True)                  # exact div (parity)
        ctx = jnp.einsum('bqk,bkd->bqd', p.astype(jnp.bfloat16), v_nb,
                         preferred_element_type=jnp.float32)        # (NH*B,S,HD)

        # reassemble heads along lanes -> (B*S, H) (single 4-piece concat)
        ctx = jnp.concatenate(
            [ctx[n * B:(n + 1) * B].reshape(B * S, HD) for n in range(NH)],
            axis=-1)

        # single full-width output projection + post-LN residual
        attn = (jnp.dot(ctx.astype(jnp.bfloat16), wo_ref[l],
                        preferred_element_type=jnp.float32) + bo_ref[l])
        h1 = _layer_norm(h + attn, ln1_g_ref[l], ln1_b_ref[l])

        # FFN.  TODO(synk): HF BERT uses exact (erf) GELU; tanh approximation used here.
        ff = (jnp.dot(h1.astype(jnp.bfloat16), w1_ref[l],
                      preferred_element_type=jnp.float32) + b1_ref[l])
        ff = jax.nn.gelu(ff, approximate=True)
        ff = (jnp.dot(ff.astype(jnp.bfloat16), w2_ref[l],
                      preferred_element_type=jnp.float32) + b2_ref[l])

        h = _layer_norm(h1 + ff, ln2_g_ref[l], ln2_b_ref[l])
        hs_ref[l + 1] = jnp.concatenate([h, lane_pad], axis=-1)

    # ---- QA head: lane-dense (B*S, 128) logits slab (columns 0:2 valid) ----
    logits_ref[...] = (jnp.dot(h.astype(jnp.bfloat16), qa_w_ref[...],
                               preferred_element_type=jnp.float32)
                       + qa_b_ref[...])


# ------------------------------ JAX-side model ------------------------------
def init_params(key):
    def normal(k, shape):
        return 0.02 * jax.random.normal(k, shape, jnp.float32)

    keys = iter(jax.random.split(key, 64))
    scale = 1.0 / math.sqrt(HD)

    def stack(shape):
        return jnp.stack([normal(next(keys), shape) for _ in range(NLAYERS)])

    wq, wk, wv = stack((H, H)), stack((H, H)), stack((H, H))
    bq = jnp.zeros((NLAYERS, 1, H), jnp.float32)
    bk = jnp.zeros((NLAYERS, 1, H), jnp.float32)
    bv = jnp.zeros((NLAYERS, 1, H), jnp.float32)
    qa_w = normal(next(keys), (H, 2))
    qa_b = jnp.zeros((1, 2), jnp.float32)

    params = {
        "word_emb": normal(next(keys), (VOCAB, H)),
        "pos_emb": normal(next(keys), (MAX_POS, H)),
        "type_emb": normal(next(keys), (TYPE_VOCAB, H)),
        "emb_ln_g": jnp.ones((1, H), jnp.float32),
        "emb_ln_b": jnp.zeros((1, H), jnp.float32),
        # fused QKV weight (wq|wk|wv on the output-lane axis), attention scale
        # folded into the q columns; MXU-operand weights stored bf16.
        "w_qkv": jnp.concatenate([wq * scale, wk, wv], axis=-1).astype(jnp.bfloat16),
        "b_qkv": jnp.concatenate([bq * scale, bk, bv], axis=-1),
        "wo": stack((H, H)).astype(jnp.bfloat16),
        "bo": jnp.zeros((NLAYERS, 1, H), jnp.float32),
        "ln1_g": jnp.ones((NLAYERS, 1, H), jnp.float32),
        "ln1_b": jnp.zeros((NLAYERS, 1, H), jnp.float32),
        "w1": stack((H, FF)).astype(jnp.bfloat16),
        "b1": jnp.zeros((NLAYERS, 1, FF), jnp.float32),
        "w2": stack((FF, H)).astype(jnp.bfloat16),
        "b2": jnp.zeros((NLAYERS, 1, H), jnp.float32),
        "ln2_g": jnp.ones((NLAYERS, 1, H), jnp.float32),
        "ln2_b": jnp.zeros((NLAYERS, 1, H), jnp.float32),
        # QA head pre-padded once to a lane-dense (H, 128) slab (cols 0:2 valid)
        "qa_w_pad": jnp.zeros((H, LANE), jnp.float32).at[:, :2].set(qa_w).astype(jnp.bfloat16),
        "qa_b_pad": jnp.zeros((1, LANE), jnp.float32).at[:, :2].set(qa_b),
    }
    return params


def bio_model_forward(params, input_ids, attention_mask, token_type_ids):
    """Mirrors BioModel.forward (inference path, output_hidden_states=True)."""
    # ---- embedding gathers (plain-JAX glue), flattened to (B*S, H) ----
    positions = jnp.arange(S, dtype=jnp.int32)
    emb = (jnp.take(params["word_emb"], input_ids, axis=0)
           + jnp.take(params["pos_emb"], positions, axis=0)[None, :, :]
           + jnp.take(params["type_emb"], token_type_ids, axis=0))   # (B, S, H)
    emb_flat = emb.reshape(B * S, H)

    # additive attention key mask, pre-replicated per head (head-major order
    # matching the kernel's (NH*B, S, HD) batched attention layout).
    ext_mask = ((1.0 - attention_mask.astype(jnp.float32)) * -10000.0)[:, None, :]
    mask_nb = jnp.tile(ext_mask, (NH, 1, 1))                         # (NH*B, 1, S)

    hs, logits_pad = pl.pallas_call(
        fused_bert_qa_kernel,
        out_shape=(jax.ShapeDtypeStruct((NLAYERS + 1, B * S, LANE), jnp.float32),
                   jax.ShapeDtypeStruct((B * S, LANE), jnp.float32)),
    )(emb_flat, mask_nb,
      params["emb_ln_g"], params["emb_ln_b"],
      params["w_qkv"], params["b_qkv"], params["wo"], params["bo"],
      params["ln1_g"], params["ln1_b"], params["w1"], params["b1"],
      params["w2"], params["b2"], params["ln2_g"], params["ln2_b"],
      params["qa_w_pad"], params["qa_b_pad"])

    start_logits = logits_pad[:, 0].reshape(B, S)   # (B, S)
    end_logits = logits_pad[:, 1].reshape(B, S)     # (B, S)
    hidden_states = tuple(hs[i, :, :H].reshape(B, S, H) for i in range(NLAYERS + 1))
    # process(batch, outputs) is identity -> return the QA model output tuple
    return start_logits, end_logits, hidden_states


# ---------------------------------- driver ----------------------------------
if __name__ == "__main__":
    key = jax.random.PRNGKey(0)
    pkey, ikey, tkey = jax.random.split(key, 3)

    params = init_params(pkey)

    input_ids = jax.random.randint(ikey, (B, S), 0, VOCAB, dtype=jnp.int32)
    attention_mask = jnp.ones((B, S), jnp.int32)
    token_type_ids = jax.random.randint(tkey, (B, S), 0, TYPE_VOCAB, dtype=jnp.int32)

    start_logits, end_logits, hidden_states = jax.jit(bio_model_forward)(
        params, input_ids, attention_mask, token_type_ids)
    jax.block_until_ready((start_logits, end_logits, hidden_states))

    assert start_logits.shape == (B, S) and end_logits.shape == (B, S)
    assert len(hidden_states) == NLAYERS + 1
    assert all(h.shape == (B, S, H) for h in hidden_states)
    print("KERNEL_OK")
</pallas_src>

<mosaic_0001>
module attributes {stable_mosaic.version = 11 : i64} {
  func.func @fused_bert_qa_kernel(%arg0: memref<16x32xf32, #tpu.memory_space<vmem>>, %arg1: memref<8x1x8xf32, #tpu.memory_space<vmem>>, %arg2: memref<1x32xf32, #tpu.memory_space<vmem>>, %arg3: memref<1x32xf32, #tpu.memory_space<vmem>>, %arg4: memref<2x32x96xbf16, #tpu.memory_space<vmem>>, %arg5: memref<2x1x96xf32, #tpu.memory_space<vmem>>, %arg6: memref<2x32x32xbf16, #tpu.memory_space<vmem>>, %arg7: memref<2x1x32xf32, #tpu.memory_space<vmem>>, %arg8: memref<2x1x32xf32, #tpu.memory_space<vmem>>, %arg9: memref<2x1x32xf32, #tpu.memory_space<vmem>>, %arg10: memref<2x32x64xbf16, #tpu.memory_space<vmem>>, %arg11: memref<2x1x64xf32, #tpu.memory_space<vmem>>, %arg12: memref<2x64x32xbf16, #tpu.memory_space<vmem>>, %arg13: memref<2x1x32xf32, #tpu.memory_space<vmem>>, %arg14: memref<2x1x32xf32, #tpu.memory_space<vmem>>, %arg15: memref<2x1x32xf32, #tpu.memory_space<vmem>>, %arg16: memref<32x128xbf16, #tpu.memory_space<vmem>>, %arg17: memref<1x128xf32, #tpu.memory_space<vmem>>, %arg18: memref<3x16x128xf32, #tpu.memory_space<vmem>>, %arg19: memref<16x128xf32, #tpu.memory_space<vmem>>) attributes {dimension_semantics = [], scalar_prefetch = 0 : i64, scratch_operands = 0 : i64, tpu.core_type = #tpu.core_type<tc>} {
    %c0 = arith.constant 0 : index
    %c0_0 = arith.constant 0 : index
    %c0_1 = arith.constant 0 : index
    %0 = vector.load %arg1[%c0, %c0_0, %c0_1] : memref<8x1x8xf32, #tpu.memory_space<vmem>>, vector<8x1x8xf32>
    %cst = arith.constant 0.000000e+00 : f32
    %1 = vector.broadcast %cst : f32 to vector<16x96xf32>
    %c0_2 = arith.constant 0 : index
    %c0_3 = arith.constant 0 : index
    %2 = vector.load %arg0[%c0_2, %c0_3] : memref<16x32xf32, #tpu.memory_space<vmem>>, vector<16x32xf32>
    %c0_4 = arith.constant 0 : index
    %c0_5 = arith.constant 0 : index
    %3 = vector.load %arg2[%c0_4, %c0_5] : memref<1x32xf32, #tpu.memory_space<vmem>>, vector<1x32xf32>
    %c0_6 = arith.constant 0 : index
    %c0_7 = arith.constant 0 : index
    %4 = vector.load %arg3[%c0_6, %c0_7] : memref<1x32xf32, #tpu.memory_space<vmem>>, vector<1x32xf32>
    %cst_8 = arith.constant dense<0.000000e+00> : vector<16xf32>
    %5 = vector.multi_reduction <add>, %2, %cst_8 [1] : vector<16x32xf32> to vector<16xf32>
    %6 = vector.shape_cast %5 : vector<16xf32> to vector<16x1xf32>
    %cst_9 = arith.constant 3.200000e+01 : f32
    %7 = vector.broadcast %cst_9 : f32 to vector<16x1xf32>
    %8 = arith.divf %6, %7 : vector<16x1xf32>
    %9 = vector.broadcast %8 : vector<16x1xf32> to vector<16x32xf32>
    %10 = arith.subf %2, %9 : vector<16x32xf32>
    %11 = arith.mulf %10, %10 : vector<16x32xf32>
    %cst_10 = arith.constant dense<0.000000e+00> : vector<16xf32>
    %12 = vector.multi_reduction <add>, %11, %cst_10 [1] : vector<16x32xf32> to vector<16xf32>
    %13 = vector.shape_cast %12 : vector<16xf32> to vector<16x1xf32>
    %cst_11 = arith.constant 3.200000e+01 : f32
    %14 = vector.broadcast %cst_11 : f32 to vector<16x1xf32>
    %15 = arith.divf %13, %14 : vector<16x1xf32>
    %16 = vector.broadcast %8 : vector<16x1xf32> to vector<16x32xf32>
    %17 = arith.subf %2, %16 : vector<16x32xf32>
    %cst_12 = arith.constant 9.99999996E-13 : f32
    %18 = vector.broadcast %cst_12 : f32 to vector<16x1xf32>
    %19 = arith.addf %15, %18 : vector<16x1xf32>
    %20 = math.rsqrt %19 : vector<16x1xf32>
    %21 = vector.broadcast %20 : vector<16x1xf32> to vector<16x32xf32>
    %22 = arith.mulf %17, %21 : vector<16x32xf32>
    %23 = vector.broadcast %3 : vector<1x32xf32> to vector<16x32xf32>
    %24 = arith.mulf %22, %23 : vector<16x32xf32>
    %25 = vector.broadcast %4 : vector<1x32xf32> to vector<16x32xf32>
    %26 = arith.addf %24, %25 : vector<16x32xf32>
    %27 = tpu.concatenate %26, %1 in 1 : vector<16x32xf32>, vector<16x96xf32> -> vector<16x128xf32>
    %c0_13 = arith.constant 0 : index
    %c0_14 = arith.constant 0 : index
    %c0_15 = arith.constant 0 : index
    %28 = vector.load %arg18[%c0_13, %c0_14, %c0_15] : memref<3x16x128xf32, #tpu.memory_space<vmem>>, vector<1x16x128xf32>
    %29 = vector.shape_cast %28 : vector<1x16x128xf32> to vector<16x128xf32>
    %30 = vector.shape_cast %27 : vector<16x128xf32> to vector<1x16x128xf32>
    tpu.vector_store %arg18[%c0_13, %c0_14, %c0_15], %30 {strides = array<i32>} : memref<3x16x128xf32, #tpu.memory_space<vmem>>, vector<1x16x128xf32>,
    %31 = arith.truncf %26 : vector<16x32xf32> to vector<16x32xbf16>
    %c0_16 = arith.constant 0 : index
    %c0_17 = arith.constant 0 : index
    %c0_18 = arith.constant 0 : index
    %32 = vector.load %arg4[%c0_16, %c0_17, %c0_18] : memref<2x32x96xbf16, #tpu.memory_space<vmem>>, vector<1x32x96xbf16>
    %33 = vector.shape_cast %32 : vector<1x32x96xbf16> to vector<32x96xbf16>
    %cst_19 = arith.constant dense<0.000000e+00> : vector<16x96xf32>
    %34 = tpu.matmul %31, %33, %cst_19 {dimension_numbers = #tpu.dot_dimension_numbers<[1], [0], [0], [1], [0, 0, 1, 1], [], []>} : vector<16x32xbf16>, vector<32x96xbf16>, vector<16x96xf32> -> vector<16x96xf32>
    %c0_20 = arith.constant 0 : index
    %c0_21 = arith.constant 0 : index
    %c0_22 = arith.constant 0 : index
    %35 = vector.load %arg5[%c0_20, %c0_21, %c0_22] : memref<2x1x96xf32, #tpu.memory_space<vmem>>, vector<1x1x96xf32>
    %36 = vector.shape_cast %35 : vector<1x1x96xf32> to vector<1x96xf32>
    %37 = vector.broadcast %36 : vector<1x96xf32> to vector<16x96xf32>
    %38 = arith.addf %34, %37 : vector<16x96xf32>
    %39 = arith.truncf %38 : vector<16x96xf32> to vector<16x96xbf16>
    %40 = vector.shape_cast %39 : vector<16x96xbf16> to vector<2x8x96xbf16>
    %41 = vector.extract_strided_slice %40 {offsets = [0, 0, 0], sizes = [2, 8, 8], strides = [1, 1, 1]} : vector<2x8x96xbf16> to vector<2x8x8xbf16>
    %42 = vector.extract_strided_slice %40 {offsets = [0, 0, 8], sizes = [2, 8, 8], strides = [1, 1, 1]} : vector<2x8x96xbf16> to vector<2x8x8xbf16>
    %43 = vector.extract_strided_slice %40 {offsets = [0, 0, 16], sizes = [2, 8, 8], strides = [1, 1, 1]} : vector<2x8x96xbf16> to vector<2x8x8xbf16>
    %44 = vector.extract_strided_slice %40 {offsets = [0, 0, 24], sizes = [2, 8, 8], strides = [1, 1, 1]} : vector<2x8x96xbf16> to vector<2x8x8xbf16>
    %45 = tpu.concatenate %41, %42, %43, %44 in 0 : vector<2x8x8xbf16>, vector<2x8x8xbf16>, vector<2x8x8xbf16>, vector<2x8x8xbf16> -> vector<8x8x8xbf16>
    %46 = vector.extract_strided_slice %40 {offsets = [0, 0, 32], sizes = [2, 8, 8], strides = [1, 1, 1]} : vector<2x8x96xbf16> to vector<2x8x8xbf16>
    %47 = vector.extract_strided_slice %40 {offsets = [0, 0, 40], sizes = [2, 8, 8], strides = [1, 1, 1]} : vector<2x8x96xbf16> to vector<2x8x8xbf16>
    %48 = vector.extract_strided_slice %40 {offsets = [0, 0, 48], sizes = [2, 8, 8], strides = [1, 1, 1]} : vector<2x8x96xbf16> to vector<2x8x8xbf16>
    %49 = vector.extract_strided_slice %40 {offsets = [0, 0, 56], sizes = [2, 8, 8], strides = [1, 1, 1]} : vector<2x8x96xbf16> to vector<2x8x8xbf16>
    %50 = tpu.concatenate %46, %47, %48, %49 in 0 : vector<2x8x8xbf16>, vector<2x8x8xbf16>, vector<2x8x8xbf16>, vector<2x8x8xbf16> -> vector<8x8x8xbf16>
    %51 = vector.extract_strided_slice %40 {offsets = [0, 0, 64], sizes = [2, 8, 8], strides = [1, 1, 1]} : vector<2x8x96xbf16> to vector<2x8x8xbf16>
    %52 = vector.extract_strided_slice %40 {offsets = [0, 0, 72], sizes = [2, 8, 8], strides = [1, 1, 1]} : vector<2x8x96xbf16> to vector<2x8x8xbf16>
    %53 = vector.extract_strided_slice %40 {offsets = [0, 0, 80], sizes = [2, 8, 8], strides = [1, 1, 1]} : vector<2x8x96xbf16> to vector<2x8x8xbf16>
    %54 = vector.extract_strided_slice %40 {offsets = [0, 0, 88], sizes = [2, 8, 8], strides = [1, 1, 1]} : vector<2x8x96xbf16> to vector<2x8x8xbf16>
    %55 = tpu.concatenate %51, %52, %53, %54 in 0 : vector<2x8x8xbf16>, vector<2x8x8xbf16>, vector<2x8x8xbf16>, vector<2x8x8xbf16> -> vector<8x8x8xbf16>
    "tpu.trace_start"() <{level = 10 : i32, message = "bqd,bkd->bqk"}> : () -> ()
    %cst_23 = arith.constant dense<0.000000e+00> : vector<8x8x8xf32>
    %56 = tpu.matmul %45, %50, %cst_23 {dimension_numbers = #tpu.dot_dimension_numbers<[2], [2], [1], [1], [0, 0, 0, 1, 1, 1], [0], [0]>} : vector<8x8x8xbf16>, vector<8x8x8xbf16>, vector<8x8x8xf32> -> vector<8x8x8xf32>
    "tpu.trace_stop"() : () -> ()
    %57 = vector.broadcast %0 : vector<8x1x8xf32> to vector<8x8x8xf32>
    %58 = arith.addf %56, %57 : vector<8x8x8xf32>
    %cst_24 = arith.constant dense<0xFF800000> : vector<8x8xf32>
    %59 = vector.multi_reduction <maximumf>, %58, %cst_24 [2] : vector<8x8x8xf32> to vector<8x8xf32>
    %60 = vector.shape_cast %59 : vector<8x8xf32> to vector<8x8x1xf32>
    %61 = vector.broadcast %60 : vector<8x8x1xf32> to vector<8x8x8xf32>
    %62 = arith.subf %58, %61 : vector<8x8x8xf32>
    %63 = math.exp %62 : vector<8x8x8xf32>
    %cst_25 = arith.constant dense<0.000000e+00> : vector<8x8xf32>
    %64 = vector.multi_reduction <add>, %63, %cst_25 [2] : vector<8x8x8xf32> to vector<8x8xf32>
    %65 = vector.shape_cast %64 : vector<8x8xf32> to vector<8x8x1xf32>
    %66 = vector.broadcast %65 : vector<8x8x1xf32> to vector<8x8x8xf32>
    %67 = arith.divf %63, %66 : vector<8x8x8xf32>
    %68 = arith.truncf %67 : vector<8x8x8xf32> to vector<8x8x8xbf16>
    "tpu.trace_start"() <{level = 10 : i32, message = "bqk,bkd->bqd"}> : () -> ()
    %cst_26 = arith.constant dense<0.000000e+00> : vector<8x8x8xf32>
    %69 = tpu.matmul %68, %55, %cst_26 {dimension_numbers = #tpu.dot_dimension_numbers<[2], [1], [1], [2], [0, 0, 0, 1, 1, 2], [0], [0]>} : vector<8x8x8xbf16>, vector<8x8x8xbf16>, vector<8x8x8xf32> -> vector<8x8x8xf32>
    "tpu.trace_stop"() : () -> ()
    %70 = vector.extract_strided_slice %69 {offsets = [0, 0, 0], sizes = [2, 8, 8], strides = [1, 1, 1]} : vector<8x8x8xf32> to vector<2x8x8xf32>
    %71 = vector.shape_cast %70 : vector<2x8x8xf32> to vector<16x8xf32>
    %72 = vector.extract_strided_slice %69 {offsets = [2, 0, 0], sizes = [2, 8, 8], strides = [1, 1, 1]} : vector<8x8x8xf32> to vector<2x8x8xf32>
    %73 = vector.shape_cast %72 : vector<2x8x8xf32> to vector<16x8xf32>
    %74 = vector.extract_strided_slice %69 {offsets = [4, 0, 0], sizes = [2, 8, 8], strides = [1, 1, 1]} : vector<8x8x8xf32> to vector<2x8x8xf32>
    %75 = vector.shape_cast %74 : vector<2x8x8xf32> to vector<16x8xf32>
    %76 = vector.extract_strided_slice %69 {offsets = [6, 0, 0], sizes = [2, 8, 8], strides = [1, 1, 1]} : vector<8x8x8xf32> to vector<2x8x8xf32>
    %77 = vector.shape_cast %76 : vector<2x8x8xf32> to vector<16x8xf32>
    %78 = tpu.concatenate %71, %73, %75, %77 in 1 : vector<16x8xf32>, vector<16x8xf32>, vector<16x8xf32>, vector<16x8xf32> -> vector<16x32xf32>
    %79 = arith.truncf %78 : vector<16x32xf32> to vector<16x32xbf16>
    %c0_27 = arith.constant 0 : index
    %c0_28 = arith.constant 0 : index
    %c0_29 = arith.constant 0 : index
    %80 = vector.load %arg6[%c0_27, %c0_28, %c0_29] : memref<2x32x32xbf16, #tpu.memory_space<vmem>>, vector<1x32x32xbf16>
    %81 = vector.shape_cast %80 : vector<1x32x32xbf16> to vector<32x32xbf16>
    %cst_30 = arith.constant dense<0.000000e+00> : vector<16x32xf32>
    %82 = tpu.matmul %79, %81, %cst_30 {dimension_numbers = #tpu.dot_dimension_numbers<[1], [0], [0], [1], [0, 0, 1, 1], [], []>} : vector<16x32xbf16>, vector<32x32xbf16>, vector<16x32xf32> -> vector<16x32xf32>
    %c0_31 = arith.constant 0 : index
    %c0_32 = arith.constant 0 : index
    %c0_33 = arith.constant 0 : index
    %83 = vector.load %arg7[%c0_31, %c0_32, %c0_33] : memref<2x1x32xf32, #tpu.memory_space<vmem>>, vector<1x1x32xf32>
    %84 = vector.shape_cast %83 : vector<1x1x32xf32> to vector<1x32xf32>
    %85 = vector.broadcast %84 : vector<1x32xf32> to vector<16x32xf32>
    %86 = arith.addf %82, %85 : vector<16x32xf32>
    %87 = arith.addf %26, %86 : vector<16x32xf32>
    %c0_34 = arith.constant 0 : index
    %c0_35 = arith.constant 0 : index
    %c0_36 = arith.constant 0 : index
    %88 = vector.load %arg8[%c0_34, %c0_35, %c0_36] : memref<2x1x32xf32, #tpu.memory_space<vmem>>, vector<1x1x32xf32>
    %89 = vector.shape_cast %88 : vector<1x1x32xf32> to vector<1x32xf32>
    %c0_37 = arith.constant 0 : index
    %c0_38 = arith.constant 0 : index
    %c0_39 = arith.constant 0 : index
    %90 = vector.load %arg9[%c0_37, %c0_38, %c0_39] : memref<2x1x32xf32, #tpu.memory_space<vmem>>, vector<1x1x32xf32>
    %91 = vector.shape_cast %90 : vector<1x1x32xf32> to vector<1x32xf32>
    %cst_40 = arith.constant dense<0.000000e+00> : vector<16xf32>
    %92 = vector.multi_reduction <add>, %87, %cst_40 [1] : vector<16x32xf32> to vector<16xf32>
    %93 = vector.shape_cast %92 : vector<16xf32> to vector<16x1xf32>
    %cst_41 = arith.constant 3.200000e+01 : f32
    %94 = vector.broadcast %cst_41 : f32 to vector<16x1xf32>
    %95 = arith.divf %93, %94 : vector<16x1xf32>
    %96 = vector.broadcast %95 : vector<16x1xf32> to vector<16x32xf32>
    %97 = arith.subf %87, %96 : vector<16x32xf32>
    %98 = arith.mulf %97, %97 : vector<16x32xf32>
    %cst_42 = arith.constant dense<0.000000e+00> : vector<16xf32>
    %99 = vector.multi_reduction <add>, %98, %cst_42 [1] : vector<16x32xf32> to vector<16xf32>
    %100 = vector.shape_cast %99 : vector<16xf32> to vector<16x1xf32>
    %cst_43 = arith.constant 3.200000e+01 : f32
    %101 = vector.broadcast %cst_43 : f32 to vector<16x1xf32>
    %102 = arith.divf %100, %101 : vector<16x1xf32>
    %103 = vector.broadcast %95 : vector<16x1xf32> to vector<16x32xf32>
    %104 = arith.subf %87, %103 : vector<16x32xf32>
    %cst_44 = arith.constant 9.99999996E-13 : f32
    %105 = vector.broadcast %cst_44 : f32 to vector<16x1xf32>
    %106 = arith.addf %102, %105 : vector<16x1xf32>
    %107 = math.rsqrt %106 : vector<16x1xf32>
    %108 = vector.broadcast %107 : vector<16x1xf32> to vector<16x32xf32>
    %109 = arith.mulf %104, %108 : vector<16x32xf32>
    %110 = vector.broadcast %89 : vector<1x32xf32> to vector<16x32xf32>
    %111 = arith.mulf %109, %110 : vector<16x32xf32>
    %112 = vector.broadcast %91 : vector<1x32xf32> to vector<16x32xf32>
    %113 = arith.addf %111, %112 : vector<16x32xf32>
    %114 = arith.truncf %113 : vector<16x32xf32> to vector<16x32xbf16>
    %c0_45 = arith.constant 0 : index
    %c0_46 = arith.constant 0 : index
    %c0_47 = arith.constant 0 : index
    %115 = vector.load %arg10[%c0_45, %c0_46, %c0_47] : memref<2x32x64xbf16, #tpu.memory_space<vmem>>, vector<1x32x64xbf16>
    %116 = vector.shape_cast %115 : vector<1x32x64xbf16> to vector<32x64xbf16>
    %cst_48 = arith.constant dense<0.000000e+00> : vector<16x64xf32>
    %117 = tpu.matmul %114, %116, %cst_48 {dimension_numbers = #tpu.dot_dimension_numbers<[1], [0], [0], [1], [0, 0, 1, 1], [], []>} : vector<16x32xbf16>, vector<32x64xbf16>, vector<16x64xf32> -> vector<16x64xf32>
    %c0_49 = arith.constant 0 : index
    %c0_50 = arith.constant 0 : index
    %c0_51 = arith.constant 0 : index
    %118 = vector.load %arg11[%c0_49, %c0_50, %c0_51] : memref<2x1x64xf32, #tpu.memory_space<vmem>>, vector<1x1x64xf32>
    %119 = vector.shape_cast %118 : vector<1x1x64xf32> to vector<1x64xf32>
    %120 = vector.broadcast %119 : vector<1x64xf32> to vector<16x64xf32>
    %121 = arith.addf %117, %120 : vector<16x64xf32>
    %122 = arith.mulf %121, %121 : vector<16x64xf32>
    %123 = arith.mulf %121, %122 : vector<16x64xf32>
    %cst_52 = arith.constant 4.471500e-02 : f32
    %124 = vector.broadcast %cst_52 : f32 to vector<16x64xf32>
    %125 = arith.mulf %124, %123 : vector<16x64xf32>
    %126 = arith.addf %121, %125 : vector<16x64xf32>
    %cst_53 = arith.constant 0.797884583 : f32
    %127 = vector.broadcast %cst_53 : f32 to vector<16x64xf32>
    %128 = arith.mulf %127, %126 : vector<16x64xf32>
    %129 = math.tanh %128 : vector<16x64xf32>
    %cst_54 = arith.constant 1.000000e+00 : f32
    %130 = vector.broadcast %cst_54 : f32 to vector<16x64xf32>
    %131 = arith.addf %130, %129 : vector<16x64xf32>
    %cst_55 = arith.constant 5.000000e-01 : f32
    %132 = vector.broadcast %cst_55 : f32 to vector<16x64xf32>
    %133 = arith.mulf %132, %131 : vector<16x64xf32>
    %134 = arith.mulf %121, %133 : vector<16x64xf32>
    %135 = arith.truncf %134 : vector<16x64xf32> to vector<16x64xbf16>
    %c0_56 = arith.constant 0 : index
    %c0_57 = arith.constant 0 : index
    %c0_58 = arith.constant 0 : index
    %136 = vector.load %arg12[%c0_56, %c0_57, %c0_58] : memref<2x64x32xbf16, #tpu.memory_space<vmem>>, vector<1x64x32xbf16>
    %137 = vector.shape_cast %136 : vector<1x64x32xbf16> to vector<64x32xbf16>
    %cst_59 = arith.constant dense<0.000000e+00> : vector<16x32xf32>
    %138 = tpu.matmul %135, %137, %cst_59 {dimension_numbers = #tpu.dot_dimension_numbers<[1], [0], [0], [1], [0, 0, 1, 1], [], []>} : vector<16x64xbf16>, vector<64x32xbf16>, vector<16x32xf32> -> vector<16x32xf32>
    %c0_60 = arith.constant 0 : index
    %c0_61 = arith.constant 0 : index
    %c0_62 = arith.constant 0 : index
    %139 = vector.load %arg13[%c0_60, %c0_61, %c0_62] : memref<2x1x32xf32, #tpu.memory_space<vmem>>, vector<1x1x32xf32>
    %140 = vector.shape_cast %139 : vector<1x1x32xf32> to vector<1x32xf32>
    %141 = vector.broadcast %140 : vector<1x32xf32> to vector<16x32xf32>
    %142 = arith.addf %138, %141 : vector<16x32xf32>
    %143 = arith.addf %113, %142 : vector<16x32xf32>
    %c0_63 = arith.constant 0 : index
    %c0_64 = arith.constant 0 : index
    %c0_65 = arith.constant 0 : index
    %144 = vector.load %arg14[%c0_63, %c0_64, %c0_65] : memref<2x1x32xf32, #tpu.memory_space<vmem>>, vector<1x1x32xf32>
    %145 = vector.shape_cast %144 : vector<1x1x32xf32> to vector<1x32xf32>
    %c0_66 = arith.constant 0 : index
    %c0_67 = arith.constant 0 : index
    %c0_68 = arith.constant 0 : index
    %146 = vector.load %arg15[%c0_66, %c0_67, %c0_68] : memref<2x1x32xf32, #tpu.memory_space<vmem>>, vector<1x1x32xf32>
    %147 = vector.shape_cast %146 : vector<1x1x32xf32> to vector<1x32xf32>
    %cst_69 = arith.constant dense<0.000000e+00> : vector<16xf32>
    %148 = vector.multi_reduction <add>, %143, %cst_69 [1] : vector<16x32xf32> to vector<16xf32>
    %149 = vector.shape_cast %148 : vector<16xf32> to vector<16x1xf32>
    %cst_70 = arith.constant 3.200000e+01 : f32
    %150 = vector.broadcast %cst_70 : f32 to vector<16x1xf32>
    %151 = arith.divf %149, %150 : vector<16x1xf32>
    %152 = vector.broadcast %151 : vector<16x1xf32> to vector<16x32xf32>
    %153 = arith.subf %143, %152 : vector<16x32xf32>
    %154 = arith.mulf %153, %153 : vector<16x32xf32>
    %cst_71 = arith.constant dense<0.000000e+00> : vector<16xf32>
    %155 = vector.multi_reduction <add>, %154, %cst_71 [1] : vector<16x32xf32> to vector<16xf32>
    %156 = vector.shape_cast %155 : vector<16xf32> to vector<16x1xf32>
    %cst_72 = arith.constant 3.200000e+01 : f32
    %157 = vector.broadcast %cst_72 : f32 to vector<16x1xf32>
    %158 = arith.divf %156, %157 : vector<16x1xf32>
    %159 = vector.broadcast %151 : vector<16x1xf32> to vector<16x32xf32>
    %160 = arith.subf %143, %159 : vector<16x32xf32>
    %cst_73 = arith.constant 9.99999996E-13 : f32
    %161 = vector.broadcast %cst_73 : f32 to vector<16x1xf32>
    %162 = arith.addf %158, %161 : vector<16x1xf32>
    %163 = math.rsqrt %162 : vector<16x1xf32>
    %164 = vector.broadcast %163 : vector<16x1xf32> to vector<16x32xf32>
    %165 = arith.mulf %160, %164 : vector<16x32xf32>
    %166 = vector.broadcast %145 : vector<1x32xf32> to vector<16x32xf32>
    %167 = arith.mulf %165, %166 : vector<16x32xf32>
    %168 = vector.broadcast %147 : vector<1x32xf32> to vector<16x32xf32>
    %169 = arith.addf %167, %168 : vector<16x32xf32>
    %170 = tpu.concatenate %169, %1 in 1 : vector<16x32xf32>, vector<16x96xf32> -> vector<16x128xf32>
    %c1 = arith.constant 1 : index
    %c0_74 = arith.constant 0 : index
    %c0_75 = arith.constant 0 : index
    %171 = vector.load %arg18[%c1, %c0_74, %c0_75] : memref<3x16x128xf32, #tpu.memory_space<vmem>>, vector<1x16x128xf32>
    %172 = vector.shape_cast %171 : vector<1x16x128xf32> to vector<16x128xf32>
    %173 = vector.shape_cast %170 : vector<16x128xf32> to vector<1x16x128xf32>
    tpu.vector_store %arg18[%c1, %c0_74, %c0_75], %173 {strides = array<i32>} : memref<3x16x128xf32, #tpu.memory_space<vmem>>, vector<1x16x128xf32>,
    %174 = arith.truncf %169 : vector<16x32xf32> to vector<16x32xbf16>
    %c1_76 = arith.constant 1 : index
    %c0_77 = arith.constant 0 : index
    %c0_78 = arith.constant 0 : index
    %175 = vector.load %arg4[%c1_76, %c0_77, %c0_78] : memref<2x32x96xbf16, #tpu.memory_space<vmem>>, vector<1x32x96xbf16>
    %176 = vector.shape_cast %175 : vector<1x32x96xbf16> to vector<32x96xbf16>
    %cst_79 = arith.constant dense<0.000000e+00> : vector<16x96xf32>
    %177 = tpu.matmul %174, %176, %cst_79 {dimension_numbers = #tpu.dot_dimension_numbers<[1], [0], [0], [1], [0, 0, 1, 1], [], []>} : vector<16x32xbf16>, vector<32x96xbf16>, vector<16x96xf32> -> vector<16x96xf32>
    %c1_80 = arith.constant 1 : index
    %c0_81 = arith.constant 0 : index
    %c0_82 = arith.constant 0 : index
    %178 = vector.load %arg5[%c1_80, %c0_81, %c0_82] : memref<2x1x96xf32, #tpu.memory_space<vmem>>, vector<1x1x96xf32>
    %179 = vector.shape_cast %178 : vector<1x1x96xf32> to vector<1x96xf32>
    %180 = vector.broadcast %179 : vector<1x96xf32> to vector<16x96xf32>
    %181 = arith.addf %177, %180 : vector<16x96xf32>
    %182 = arith.truncf %181 : vector<16x96xf32> to vector<16x96xbf16>
    %183 = vector.shape_cast %182 : vector<16x96xbf16> to vector<2x8x96xbf16>
    %184 = vector.extract_strided_slice %183 {offsets = [0, 0, 0], sizes = [2, 8, 8], strides = [1, 1, 1]} : vector<2x8x96xbf16> to vector<2x8x8xbf16>
    %185 = vector.extract_strided_slice %183 {offsets = [0, 0, 8], sizes = [2, 8, 8], strides = [1, 1, 1]} : vector<2x8x96xbf16> to vector<2x8x8xbf16>
    %186 = vector.extract_strided_slice %183 {offsets = [0, 0, 16], sizes = [2, 8, 8], strides = [1, 1, 1]} : vector<2x8x96xbf16> to vector<2x8x8xbf16>
    %187 = vector.extract_strided_slice %183 {offsets = [0, 0, 24], sizes = [2, 8, 8], strides = [1, 1, 1]} : vector<2x8x96xbf16> to vector<2x8x8xbf16>
    %188 = tpu.concatenate %184, %185, %186, %187 in 0 : vector<2x8x8xbf16>, vector<2x8x8xbf16>, vector<2x8x8xbf16>, vector<2x8x8xbf16> -> vector<8x8x8xbf16>
    %189 = vector.extract_strided_slice %183 {offsets = [0, 0, 32], sizes = [2, 8, 8], strides = [1, 1, 1]} : vector<2x8x96xbf16> to vector<2x8x8xbf16>
    %190 = vector.extract_strided_slice %183 {offsets = [0, 0, 40], sizes = [2, 8, 8], strides = [1, 1, 1]} : vector<2x8x96xbf16> to vector<2x8x8xbf16>
    %191 = vector.extract_strided_slice %183 {offsets = [0, 0, 48], sizes = [2, 8, 8], strides = [1, 1, 1]} : vector<2x8x96xbf16> to vector<2x8x8xbf16>
    %192 = vector.extract_strided_slice %183 {offsets = [0, 0, 56], sizes = [2, 8, 8], strides = [1, 1, 1]} : vector<2x8x96xbf16> to vector<2x8x8xbf16>
    %193 = tpu.concatenate %189, %190, %191, %192 in 0 : vector<2x8x8xbf16>, vector<2x8x8xbf16>, vector<2x8x8xbf16>, vector<2x8x8xbf16> -> vector<8x8x8xbf16>
    %194 = vector.extract_strided_slice %183 {offsets = [0, 0, 64], sizes = [2, 8, 8], strides = [1, 1, 1]} : vector<2x8x96xbf16> to vector<2x8x8xbf16>
    %195 = vector.extract_strided_slice %183 {offsets = [0, 0, 72], sizes = [2, 8, 8], strides = [1, 1, 1]} : vector<2x8x96xbf16> to vector<2x8x8xbf16>
    %196 = vector.extract_strided_slice %183 {offsets = [0, 0, 80], sizes = [2, 8, 8], strides = [1, 1, 1]} : vector<2x8x96xbf16> to vector<2x8x8xbf16>
    %197 = vector.extract_strided_slice %183 {offsets = [0, 0, 88], sizes = [2, 8, 8], strides = [1, 1, 1]} : vector<2x8x96xbf16> to vector<2x8x8xbf16>
    %198 = tpu.concatenate %194, %195, %196, %197 in 0 : vector<2x8x8xbf16>, vector<2x8x8xbf16>, vector<2x8x8xbf16>, vector<2x8x8xbf16> -> vector<8x8x8xbf16>
    "tpu.trace_start"() <{level = 10 : i32, message = "bqd,bkd->bqk"}> : () -> ()
    %cst_83 = arith.constant dense<0.000000e+00> : vector<8x8x8xf32>
    %199 = tpu.matmul %188, %193, %cst_83 {dimension_numbers = #tpu.dot_dimension_numbers<[2], [2], [1], [1], [0, 0, 0, 1, 1, 1], [0], [0]>} : vector<8x8x8xbf16>, vector<8x8x8xbf16>, vector<8x8x8xf32> -> vector<8x8x8xf32>
    "tpu.trace_stop"() : () -> ()
    %200 = vector.broadcast %0 : vector<8x1x8xf32> to vector<8x8x8xf32>
    %201 = arith.addf %199, %200 : vector<8x8x8xf32>
    %cst_84 = arith.constant dense<0xFF800000> : vector<8x8xf32>
    %202 = vector.multi_reduction <maximumf>, %201, %cst_84 [2] : vector<8x8x8xf32> to vector<8x8xf32>
    %203 = vector.shape_cast %202 : vector<8x8xf32> to vector<8x8x1xf32>
    %204 = vector.broadcast %203 : vector<8x8x1xf32> to vector<8x8x8xf32>
    %205 = arith.subf %201, %204 : vector<8x8x8xf32>
    %206 = math.exp %205 : vector<8x8x8xf32>
    %cst_85 = arith.constant dense<0.000000e+00> : vector<8x8xf32>
    %207 = vector.multi_reduction <add>, %206, %cst_85 [2] : vector<8x8x8xf32> to vector<8x8xf32>
    %208 = vector.shape_cast %207 : vector<8x8xf32> to vector<8x8x1xf32>
    %209 = vector.broadcast %208 : vector<8x8x1xf32> to vector<8x8x8xf32>
    %210 = arith.divf %206, %209 : vector<8x8x8xf32>
    %211 = arith.truncf %210 : vector<8x8x8xf32> to vector<8x8x8xbf16>
    "tpu.trace_start"() <{level = 10 : i32, message = "bqk,bkd->bqd"}> : () -> ()
    %cst_86 = arith.constant dense<0.000000e+00> : vector<8x8x8xf32>
    %212 = tpu.matmul %211, %198, %cst_86 {dimension_numbers = #tpu.dot_dimension_numbers<[2], [1], [1], [2], [0, 0, 0, 1, 1, 2], [0], [0]>} : vector<8x8x8xbf16>, vector<8x8x8xbf16>, vector<8x8x8xf32> -> vector<8x8x8xf32>
    "tpu.trace_stop"() : () -> ()
    %213 = vector.extract_strided_slice %212 {offsets = [0, 0, 0], sizes = [2, 8, 8], strides = [1, 1, 1]} : vector<8x8x8xf32> to vector<2x8x8xf32>
    %214 = vector.shape_cast %213 : vector<2x8x8xf32> to vector<16x8xf32>
    %215 = vector.extract_strided_slice %212 {offsets = [2, 0, 0], sizes = [2, 8, 8], strides = [1, 1, 1]} : vector<8x8x8xf32> to vector<2x8x8xf32>
    %216 = vector.shape_cast %215 : vector<2x8x8xf32> to vector<16x8xf32>
    %217 = vector.extract_strided_slice %212 {offsets = [4, 0, 0], sizes = [2, 8, 8], strides = [1, 1, 1]} : vector<8x8x8xf32> to vector<2x8x8xf32>
    %218 = vector.shape_cast %217 : vector<2x8x8xf32> to vector<16x8xf32>
    %219 = vector.extract_strided_slice %212 {offsets = [6, 0, 0], sizes = [2, 8, 8], strides = [1, 1, 1]} : vector<8x8x8xf32> to vector<2x8x8xf32>
    %220 = vector.shape_cast %219 : vector<2x8x8xf32> to vector<16x8xf32>
    %221 = tpu.concatenate %214, %216, %218, %220 in 1 : vector<16x8xf32>, vector<16x8xf32>, vector<16x8xf32>, vector<16x8xf32> -> vector<16x32xf32>
    %222 = arith.truncf %221 : vector<16x32xf32> to vector<16x32xbf16>
    %c1_87 = arith.constant 1 : index
    %c0_88 = arith.constant 0 : index
    %c0_89 = arith.constant 0 : index
    %223 = vector.load %arg6[%c1_87, %c0_88, %c0_89] : memref<2x32x32xbf16, #tpu.memory_space<vmem>>, vector<1x32x32xbf16>
    %224 = vector.shape_cast %223 : vector<1x32x32xbf16> to vector<32x32xbf16>
    %cst_90 = arith.constant dense<0.000000e+00> : vector<16x32xf32>
    %225 = tpu.matmul %222, %224, %cst_90 {dimension_numbers = #tpu.dot_dimension_numbers<[1], [0], [0], [1], [0, 0, 1, 1], [], []>} : vector<16x32xbf16>, vector<32x32xbf16>, vector<16x32xf32> -> vector<16x32xf32>
    %c1_91 = arith.constant 1 : index
    %c0_92 = arith.constant 0 : index
    %c0_93 = arith.constant 0 : index
    %226 = vector.load %arg7[%c1_91, %c0_92, %c0_93] : memref<2x1x32xf32, #tpu.memory_space<vmem>>, vector<1x1x32xf32>
    %227 = vector.shape_cast %226 : vector<1x1x32xf32> to vector<1x32xf32>
    %228 = vector.broadcast %227 : vector<1x32xf32> to vector<16x32xf32>
    %229 = arith.addf %225, %228 : vector<16x32xf32>
    %230 = arith.addf %169, %229 : vector<16x32xf32>
    %c1_94 = arith.constant 1 : index
    %c0_95 = arith.constant 0 : index
    %c0_96 = arith.constant 0 : index
    %231 = vector.load %arg8[%c1_94, %c0_95, %c0_96] : memref<2x1x32xf32, #tpu.memory_space<vmem>>, vector<1x1x32xf32>
    %232 = vector.shape_cast %231 : vector<1x1x32xf32> to vector<1x32xf32>
    %c1_97 = arith.constant 1 : index
    %c0_98 = arith.constant 0 : index
    %c0_99 = arith.constant 0 : index
    %233 = vector.load %arg9[%c1_97, %c0_98, %c0_99] : memref<2x1x32xf32, #tpu.memory_space<vmem>>, vector<1x1x32xf32>
    %234 = vector.shape_cast %233 : vector<1x1x32xf32> to vector<1x32xf32>
    %cst_100 = arith.constant dense<0.000000e+00> : vector<16xf32>
    %235 = vector.multi_reduction <add>, %230, %cst_100 [1] : vector<16x32xf32> to vector<16xf32>
    %236 = vector.shape_cast %235 : vector<16xf32> to vector<16x1xf32>
    %cst_101 = arith.constant 3.200000e+01 : f32
    %237 = vector.broadcast %cst_101 : f32 to vector<16x1xf32>
    %238 = arith.divf %236, %237 : vector<16x1xf32>
    %239 = vector.broadcast %238 : vector<16x1xf32> to vector<16x32xf32>
    %240 = arith.subf %230, %239 : vector<16x32xf32>
    %241 = arith.mulf %240, %240 : vector<16x32xf32>
    %cst_102 = arith.constant dense<0.000000e+00> : vector<16xf32>
    %242 = vector.multi_reduction <add>, %241, %cst_102 [1] : vector<16x32xf32> to vector<16xf32>
    %243 = vector.shape_cast %242 : vector<16xf32> to vector<16x1xf32>
    %cst_103 = arith.constant 3.200000e+01 : f32
    %244 = vector.broadcast %cst_103 : f32 to vector<16x1xf32>
    %245 = arith.divf %243, %244 : vector<16x1xf32>
    %246 = vector.broadcast %238 : vector<16x1xf32> to vector<16x32xf32>
    %247 = arith.subf %230, %246 : vector<16x32xf32>
    %cst_104 = arith.constant 9.99999996E-13 : f32
    %248 = vector.broadcast %cst_104 : f32 to vector<16x1xf32>
    %249 = arith.addf %245, %248 : vector<16x1xf32>
    %250 = math.rsqrt %249 : vector<16x1xf32>
    %251 = vector.broadcast %250 : vector<16x1xf32> to vector<16x32xf32>
    %252 = arith.mulf %247, %251 : vector<16x32xf32>
    %253 = vector.broadcast %232 : vector<1x32xf32> to vector<16x32xf32>
    %254 = arith.mulf %252, %253 : vector<16x32xf32>
    %255 = vector.broadcast %234 : vector<1x32xf32> to vector<16x32xf32>
    %256 = arith.addf %254, %255 : vector<16x32xf32>
    %257 = arith.truncf %256 : vector<16x32xf32> to vector<16x32xbf16>
    %c1_105 = arith.constant 1 : index
    %c0_106 = arith.constant 0 : index
    %c0_107 = arith.constant 0 : index
    %258 = vector.load %arg10[%c1_105, %c0_106, %c0_107] : memref<2x32x64xbf16, #tpu.memory_space<vmem>>, vector<1x32x64xbf16>
    %259 = vector.shape_cast %258 : vector<1x32x64xbf16> to vector<32x64xbf16>
    %cst_108 = arith.constant dense<0.000000e+00> : vector<16x64xf32>
    %260 = tpu.matmul %257, %259, %cst_108 {dimension_numbers = #tpu.dot_dimension_numbers<[1], [0], [0], [1], [0, 0, 1, 1], [], []>} : vector<16x32xbf16>, vector<32x64xbf16>, vector<16x64xf32> -> vector<16x64xf32>
    %c1_109 = arith.constant 1 : index
    %c0_110 = arith.constant 0 : index
    %c0_111 = arith.constant 0 : index
    %261 = vector.load %arg11[%c1_109, %c0_110, %c0_111] : memref<2x1x64xf32, #tpu.memory_space<vmem>>, vector<1x1x64xf32>
    %262 = vector.shape_cast %261 : vector<1x1x64xf32> to vector<1x64xf32>
    %263 = vector.broadcast %262 : vector<1x64xf32> to vector<16x64xf32>
    %264 = arith.addf %260, %263 : vector<16x64xf32>
    %265 = arith.mulf %264, %264 : vector<16x64xf32>
    %266 = arith.mulf %264, %265 : vector<16x64xf32>
    %cst_112 = arith.constant 4.471500e-02 : f32
    %267 = vector.broadcast %cst_112 : f32 to vector<16x64xf32>
    %268 = arith.mulf %267, %266 : vector<16x64xf32>
    %269 = arith.addf %264, %268 : vector<16x64xf32>
    %cst_113 = arith.constant 0.797884583 : f32
    %270 = vector.broadcast %cst_113 : f32 to vector<16x64xf32>
    %271 = arith.mulf %270, %269 : vector<16x64xf32>
    %272 = math.tanh %271 : vector<16x64xf32>
    %cst_114 = arith.constant 1.000000e+00 : f32
    %273 = vector.broadcast %cst_114 : f32 to vector<16x64xf32>
    %274 = arith.addf %273, %272 : vector<16x64xf32>
    %cst_115 = arith.constant 5.000000e-01 : f32
    %275 = vector.broadcast %cst_115 : f32 to vector<16x64xf32>
    %276 = arith.mulf %275, %274 : vector<16x64xf32>
    %277 = arith.mulf %264, %276 : vector<16x64xf32>
    %278 = arith.truncf %277 : vector<16x64xf32> to vector<16x64xbf16>
    %c1_116 = arith.constant 1 : index
    %c0_117 = arith.constant 0 : index
    %c0_118 = arith.constant 0 : index
    %279 = vector.load %arg12[%c1_116, %c0_117, %c0_118] : memref<2x64x32xbf16, #tpu.memory_space<vmem>>, vector<1x64x32xbf16>
    %280 = vector.shape_cast %279 : vector<1x64x32xbf16> to vector<64x32xbf16>
    %cst_119 = arith.constant dense<0.000000e+00> : vector<16x32xf32>
    %281 = tpu.matmul %278, %280, %cst_119 {dimension_numbers = #tpu.dot_dimension_numbers<[1], [0], [0], [1], [0, 0, 1, 1], [], []>} : vector<16x64xbf16>, vector<64x32xbf16>, vector<16x32xf32> -> vector<16x32xf32>
    %c1_120 = arith.constant 1 : index
    %c0_121 = arith.constant 0 : index
    %c0_122 = arith.constant 0 : index
    %282 = vector.load %arg13[%c1_120, %c0_121, %c0_122] : memref<2x1x32xf32, #tpu.memory_space<vmem>>, vector<1x1x32xf32>
    %283 = vector.shape_cast %282 : vector<1x1x32xf32> to vector<1x32xf32>
    %284 = vector.broadcast %283 : vector<1x32xf32> to vector<16x32xf32>
    %285 = arith.addf %281, %284 : vector<16x32xf32>
    %286 = arith.addf %256, %285 : vector<16x32xf32>
    %c1_123 = arith.constant 1 : index
    %c0_124 = arith.constant 0 : index
    %c0_125 = arith.constant 0 : index
    %287 = vector.load %arg14[%c1_123, %c0_124, %c0_125] : memref<2x1x32xf32, #tpu.memory_space<vmem>>, vector<1x1x32xf32>
    %288 = vector.shape_cast %287 : vector<1x1x32xf32> to vector<1x32xf32>
    %c1_126 = arith.constant 1 : index
    %c0_127 = arith.constant 0 : index
    %c0_128 = arith.constant 0 : index
    %289 = vector.load %arg15[%c1_126, %c0_127, %c0_128] : memref<2x1x32xf32, #tpu.memory_space<vmem>>, vector<1x1x32xf32>
    %290 = vector.shape_cast %289 : vector<1x1x32xf32> to vector<1x32xf32>
    %cst_129 = arith.constant dense<0.000000e+00> : vector<16xf32>
    %291 = vector.multi_reduction <add>, %286, %cst_129 [1] : vector<16x32xf32> to vector<16xf32>
    %292 = vector.shape_cast %291 : vector<16xf32> to vector<16x1xf32>
    %cst_130 = arith.constant 3.200000e+01 : f32
    %293 = vector.broadcast %cst_130 : f32 to vector<16x1xf32>
    %294 = arith.divf %292, %293 : vector<16x1xf32>
    %295 = vector.broadcast %294 : vector<16x1xf32> to vector<16x32xf32>
    %296 = arith.subf %286, %295 : vector<16x32xf32>
    %297 = arith.mulf %296, %296 : vector<16x32xf32>
    %cst_131 = arith.constant dense<0.000000e+00> : vector<16xf32>
    %298 = vector.multi_reduction <add>, %297, %cst_131 [1] : vector<16x32xf32> to vector<16xf32>
    %299 = vector.shape_cast %298 : vector<16xf32> to vector<16x1xf32>
    %cst_132 = arith.constant 3.200000e+01 : f32
    %300 = vector.broadcast %cst_132 : f32 to vector<16x1xf32>
    %301 = arith.divf %299, %300 : vector<16x1xf32>
    %302 = vector.broadcast %294 : vector<16x1xf32> to vector<16x32xf32>
    %303 = arith.subf %286, %302 : vector<16x32xf32>
    %cst_133 = arith.constant 9.99999996E-13 : f32
    %304 = vector.broadcast %cst_133 : f32 to vector<16x1xf32>
    %305 = arith.addf %301, %304 : vector<16x1xf32>
    %306 = math.rsqrt %305 : vector<16x1xf32>
    %307 = vector.broadcast %306 : vector<16x1xf32> to vector<16x32xf32>
    %308 = arith.mulf %303, %307 : vector<16x32xf32>
    %309 = vector.broadcast %288 : vector<1x32xf32> to vector<16x32xf32>
    %310 = arith.mulf %308, %309 : vector<16x32xf32>
    %311 = vector.broadcast %290 : vector<1x32xf32> to vector<16x32xf32>
    %312 = arith.addf %310, %311 : vector<16x32xf32>
    %313 = tpu.concatenate %312, %1 in 1 : vector<16x32xf32>, vector<16x96xf32> -> vector<16x128xf32>
    %c2 = arith.constant 2 : index
    %c0_134 = arith.constant 0 : index
    %c0_135 = arith.constant 0 : index
    %314 = vector.load %arg18[%c2, %c0_134, %c0_135] : memref<3x16x128xf32, #tpu.memory_space<vmem>>, vector<1x16x128xf32>
    %315 = vector.shape_cast %314 : vector<1x16x128xf32> to vector<16x128xf32>
    %316 = vector.shape_cast %313 : vector<16x128xf32> to vector<1x16x128xf32>
    tpu.vector_store %arg18[%c2, %c0_134, %c0_135], %316 {strides = array<i32>} : memref<3x16x128xf32, #tpu.memory_space<vmem>>, vector<1x16x128xf32>,
    %317 = arith.truncf %312 : vector<16x32xf32> to vector<16x32xbf16>
    %c0_136 = arith.constant 0 : index
    %c0_137 = arith.constant 0 : index
    %318 = vector.load %arg16[%c0_136, %c0_137] : memref<32x128xbf16, #tpu.memory_space<vmem>>, vector<32x128xbf16>
    %cst_138 = arith.constant dense<0.000000e+00> : vector<16x128xf32>
    %319 = tpu.matmul %317, %318, %cst_138 {dimension_numbers = #tpu.dot_dimension_numbers<[1], [0], [0], [1], [0, 0, 1, 1], [], []>} : vector<16x32xbf16>, vector<32x128xbf16>, vector<16x128xf32> -> vector<16x128xf32>
    %c0_139 = arith.constant 0 : index
    %c0_140 = arith.constant 0 : index
    %320 = vector.load %arg17[%c0_139, %c0_140] : memref<1x128xf32, #tpu.memory_space<vmem>>, vector<1x128xf32>
    %321 = vector.broadcast %320 : vector<1x128xf32> to vector<16x128xf32>
    %322 = arith.addf %319, %321 : vector<16x128xf32>
    %c0_141 = arith.constant 0 : index
    %c0_142 = arith.constant 0 : index
    %323 = vector.load %arg19[%c0_141, %c0_142] : memref<16x128xf32, #tpu.memory_space<vmem>>, vector<16x128xf32>
    tpu.vector_store %arg19[%c0_141, %c0_142], %322 {strides = array<i32>} : memref<16x128xf32, #tpu.memory_space<vmem>>, vector<16x128xf32>,
    return
  }
}

</mosaic_0001>

<bundles_post_ra>
// kernel: squeeze.5
= control target key start
LH: loop header
LB: loop body
LE: loop exit
PB: predicated region body
PF: predicated region fallthrough
CT: control target
= control target key end

     0   :  { %s80_s0 = inlined_call_operand.vmem [shape: f32[16], index: 0, kind: input, shape index: {}]   ;;  %s81_s1 = inlined_call_operand.hbm [shape: f32[2,8], index: 1, kind: output, shape index: {}]  }
   0x1   :  { %v5_v0 = vld [vmem:[%s80_s0] sm:$0x1] }
   0x2   :  { %2 = vsyncpa [#allocation1], 0  ;;  %6 = vst [vmem:[#allocation3] sm:$0x1] %v5_v0  ;;  %vm8_vm0 = vcmask 64512   ;;  %s62_s0 = smov 120  }
   0x3   :  { %s63_s8 = smov [#allocation0]   ;;  %s27_s1 = sshll.u32 %s81_s1, 4  ;;  %s28_s1 = int_to_ptr.hbm [resolvable:$true] %s27_s1 }
   0x4   :  { %s25_s9 = sshll.u32 %s63_s8, 4  ;;  %s26_s9 = int_to_ptr.vmem [resolvable:$true] %s25_s9 }
   0x9   :  { %v10_v1 = vld [vmem:[#allocation3] sm:$0x1]  }
   0xa   :  { %v7_v2 = vld [vmem:[#allocation3] sm:$0x1]   ;;  %11 = vrot.lane.b32.xlu0 %v10_v1, %s62_s0 }
   0xb   :  { %9 = vst.msk [vmem:[#allocation2] sm:$0x1] %vm8_vm0, %v7_v2  }
  0x7c   :  { %v12_v3 = vpop.permute.xlu0 %11  }
  0x7d   :  { %15 = vst.msk [vmem:[#allocation2 + $0x1] sm:$0x1] %vm8_vm0, %v12_v3  }
  0x84   :  { %v18_v4 = vld [vmem:[#allocation2] sm:$0x3] }
  0x85   :  { %21 = vst [vmem:[#allocation0] sm:$0x3] %v18_v4 }
  0x86   :  { %30 = dma.vmem_to_hbm [thread:$0]  %s26_s9, 32, %s28_s1, [#allocation1]  }
  0x87   :  { %60 = dma.done.wait [#allocation1], 32  }
  0x88   :  { %61 = vsyncadd [#allocation1], 4294967264 }
  0x89   :  { %33 = vsyncpa [#allocation1], 1 }

// kernel: bio_model_forward.1
= control target key start
LH: loop header
LB: loop body
LE: loop exit
PB: predicated region body
PF: predicated region fallthrough
CT: control target
= control target key end

     0   :  { %vm74_vm0 = vcmask 261120   ;;  %v2390_v4 = vmov 32.0   ;;  %s2391_s23 = smov 104   ;;  %s2392_s24 = smov 120   ;;  %vm222_vm8 = vcmask 64512   ;;  %vm608_vm9 = vcmask 1043456   ;;  %s3086_s0 = inlined_call_operand.vmem [shape: f32[16,32], index: 0, kind: input, shape index: {}]   ;;  %s3087_s2 = inlined_call_operand.vmem [shape: f32[1,32], index: 2, kind: input, shape index: {}]   ;;  %s3088_s3 = inlined_call_operand.vmem [shape: f32[1,32], index: 3, kind: input, shape index: {}]   ;;  %s3089_s5 = inlined_call_operand.vmem [shape: f32[2,1,96], index: 5, kind: input, shape index: {}]   ;;  %s3090_s4 = inlined_call_operand.vmem [shape: bf16[2,32,96], index: 4, kind: input, shape index: {}]   ;;  %s3091_s18 = inlined_call_operand.vmem [shape: f32[3,16,128], index: 18, kind: output, shape index: {0}]   ;;  %s3092_s1 = inlined_call_operand.vmem [shape: f32[8,1,8], index: 1, kind: input, shape index: {}]   ;;  %s3093_s7 = inlined_call_operand.vmem [shape: f32[2,1,32], index: 7, kind: input, shape index: {}]   ;;  %s3094_s6 = inlined_call_operand.vmem [shape: bf16[2,32,32], index: 6, kind: input, shape index: {}]   ;;  %s3095_s8 = inlined_call_operand.vmem [shape: f32[2,1,32], index: 8, kind: input, shape index: {}]   ;;  %s3096_s9 = inlined_call_operand.vmem [shape: f32[2,1,32], index: 9, kind: input, shape index: {}]   ;;  %s3097_s11 = inlined_call_operand.vmem [shape: f32[2,1,64], index: 11, kind: input, shape index: {}]   ;;  %s3098_s10 = inlined_call_operand.vmem [shape: bf16[2,32,64], index: 10, kind: input, shape index: {}]   ;;  %s3099_s13 = inlined_call_operand.vmem [shape: f32[2,1,32], index: 13, kind: input, shape index: {}]   ;;  %s3100_s12 = inlined_call_operand.vmem [shape: bf16[2,64,32], index: 12, kind: input, shape index: {}]   ;;  %s3101_s14 = inlined_call_operand.vmem [shape: f32[2,1,32], index: 14, kind: input, shape index: {}]   ;;  %s3102_s15 = inlined_call_operand.vmem [shape: f32[2,1,32], index: 15, kind: input, shape index: {}]   ;;  %s3103_s17 = inlined_call_operand.vmem [shape: f32[1,128], index: 17, kind: input, shape index: {}]   ;;  %s3104_s16 = inlined_call_operand.vmem [shape: bf16[32,128], index: 16, kind: input, shape index: {}]   ;;  %s3105_s19 = inlined_call_operand.vmem [shape: f32[16,128], index: 19, kind: output, shape index: {1}]  }
   0x1   :  { %3111 = sst [smem:[#allocation2_spill]] %s3086_s0  ;;  %2288 = vrcp.f32 %v2390_v4  ;;  %v2201_v21 = vld [vmem:[%s3090_s4 + $0x8] sm:$0xff]  ;;  %v2200_v23 = vld [vmem:[%s3090_s4] sm:$0xff]  ;;  %s2393_s25 = smov 112  }
   0x2   :  { %3112 = sst [smem:[#allocation3_spill]] %s3087_s2  ;;  %170 = vmatpush.bf16.msra.mxu0 %v2201_v21  ;;  %s3110_s2 = smov 16  }
   0x3   :  { %3113 = sst [smem:[#allocation4_spill]] %s3088_s3  ;;  %s3109_s22 = smov 8  }
   0x4   :  { %3114 = sst [smem:[#allocation5_spill]] %s3089_s5  ;;  %s2394_s5 = smov 96  }
   0x5   :  { %s3115_s20 = sld [smem:[#allocation2_spill]]  ;;  %s3108_s27 = smov 24  }
   0x6   :  { %171 = vmatpush.bf16.msra.mxu0 %v2200_v23  ;;  %s3116_s26 = sld [smem:[#allocation3_spill]] }
   0x7   :  { %v2289_v5 = vpop.eup %2288  ;;  %s3117_s29 = sld [smem:[#allocation4_spill]] }
   0x8   :  { %v82_v6 = vmul.f32 32.0, %v2289_v5  ;;  %vm86_vm1 = vweird.f32 %v2289_v5  ;;  %s3118_s3 = sld [smem:[#allocation5_spill]] }
   0xa   :  { %v83_v7 = vsub.f32 1.0, %v82_v6 }
   0xb   :  { %v70_v0 = vld [vmem:[%s3115_s20] sm:$0xff]  ;;  %v71_v2 = vld [vmem:[%s3115_s20 + $0x8] sm:$0xff] }
   0xc   :  { %v75_v1 = vsel %vm74_vm0, %v70_v0, 0.0  ;;  %v78_v3 = vsel %vm74_vm0, %v71_v2, 0.0  ;;  %v84_v8 = vmul.f32 %v2289_v5, %v83_v7  ;;  %v2261_v37 = vld [vmem:[%s3116_s26] ss:$0 sm:$0xff]  ;;  %s2395_s26 = smov 64  }
   0xd   :  { %76 = vadd.xlane.f32.xlu0 %v75_v1  ;;  %v2262_v41 = vld [vmem:[%s3117_s29] ss:$0 sm:$0xff] }
   0xe   :  { %v85_v9 = vadd.f32 %v2289_v5, %v84_v8  ;;  %v2263_v54 = vld [vmem:[%s3118_s3] ss:$0 sm:$0xff] }
  0x10   :  { %v2507_v10 = vsel %vm86_vm1, %v2289_v5, %v85_v9 }
  0x15   :  { %79 = vadd.xlane.f32.xlu0 %v78_v3 }
  0x80   :  { %v77_v11 = vpop.xlane.xlu0 %76 }
  0x81   :  { %v88_v12 = vmul.f32 %v2507_v10, %v77_v11 }
  0x83   :  { %v90_v13 = vsub.f32 %v70_v0, %v88_v12 }
  0x85   :  { %v92_v14 = vmul.f32 %v90_v13, %v90_v13 }
  0x87   :  { %v94_v15 = vsel %vm74_vm0, %v92_v14, 0.0 }
  0x88   :  { %95 = vadd.xlane.f32.xlu1 %v94_v15  ;;  %v80_v16 = vpop.xlane.xlu0 %79 }
  0x89   :  { %v89_v17 = vmul.f32 %v2507_v10, %v80_v16 }
  0x8b   :  { %v91_v18 = vsub.f32 %v71_v2, %v89_v17 }
  0x8d   :  { %v93_v19 = vmul.f32 %v91_v18, %v91_v18 }
  0x8f   :  { %v97_v20 = vsel %vm74_vm0, %v93_v19, 0.0 }
  0x90   :  { %98 = vadd.xlane.f32.xlu1 %v97_v20 }
  0xfb   :  { %v96_v22 = vpop.xlane.xlu1 %95 }
  0xfc   :  { %v100_v24 = vmul.f32 %v96_v22, %v2507_v10 }
  0xfe   :  { %v102_v25 = vadd.f32 1e-12, %v100_v24 }
 0x100   :  { %2290 = vrsqrt.f32 %v102_v25  ;;  %vm110_vm3 = vweird.f32 %v102_v25 }
 0x103   :  { %v99_v26 = vpop.xlane.xlu1 %98 }
 0x104   :  { %v101_v27 = vmul.f32 %v99_v26, %v2507_v10 }
 0x106   :  { %v2291_v28 = vpop.eup %2290  ;;  %v103_v29 = vadd.f32 1e-12, %v101_v27 }
 0x107   :  { %v105_v30 = vmul.f32 %v2291_v28, %v102_v25  ;;  %vm111_vm2 = vweird.f32 %v2291_v28 }
 0x108   :  { %2292 = vrsqrt.f32 %v103_v29  ;;  %vm112_vm4 = vmor %vm110_vm3, %vm111_vm2  ;;  %vm120_vm6 = vweird.f32 %v103_v29 }
 0x109   :  { %v106_v31 = vmul.f32 %v2291_v28, %v105_v30 }
 0x10b   :  { %v107_v32 = vmul.f32 0.5, %v106_v31 }
 0x10d   :  { %v108_v33 = vsub.f32 1.5, %v107_v32 }
 0x10e   :  { %v2293_v34 = vpop.eup %2292 }
 0x10f   :  { %v109_v35 = vmul.f32 %v2291_v28, %v108_v33  ;;  %v115_v36 = vmul.f32 %v2293_v34, %v103_v29  ;;  %vm121_vm5 = vweird.f32 %v2293_v34 }
 0x110   :  { %vm122_vm7 = vmor %vm120_vm6, %vm121_vm5 }
 0x111   :  { %v113_v38 = vsel %vm112_vm4, %v2291_v28, %v109_v35  ;;  %v116_v39 = vmul.f32 %v2293_v34, %v115_v36 }
 0x112   :  { %v124_v40 = vmul.f32 %v113_v38, %v90_v13  ;;  %v2264_v38 = vld [vmem:[%s3092_s1 + $0x1] ss:$0 sm:$0xff] }
 0x113   :  { %v117_v42 = vmul.f32 0.5, %v116_v39  ;;  %v2265_v39 = vld [vmem:[%s3092_s1] ss:$0 sm:$0xff] }
 0x114   :  { %v129_v43 = vmul.f32 %v2261_v37, %v124_v40 }
 0x115   :  { %v118_v44 = vsub.f32 1.5, %v117_v42 }
 0x116   :  { %v2527_v45 = vadd.f32 %v2262_v41, %v129_v43 }
 0x117   :  { %v119_v46 = vmul.f32 %v2293_v34, %v118_v44 }
 0x118   :  { %v136_v47 = vsel %vm74_vm0, %v2527_v45, 0.0 }
 0x119   :  { %v123_v48 = vsel %vm122_vm7, %v2293_v34, %v119_v46  ;;  %138 = vst [vmem:[%s3091_s18] sm:$0xff] %v136_v47 }
 0x11a   :  { %v125_v49 = vmul.f32 %v123_v48, %v91_v18 }
 0x11c   :  { %v130_v50 = vmul.f32 %v2261_v37, %v125_v49  ;;  %v2266_v49 = vld [vmem:[%s3092_s1 + $0x2] ss:$0 sm:$0xff] }
 0x11e   :  { %v2534_v51 = vadd.f32 %v2262_v41, %v130_v50 }
 0x120   :  { %v137_v52 = vsel %vm74_vm0, %v2534_v51, 0.0  ;;  %v140_v53 = vpack.c.bf16 %v2534_v51, %v2527_v45 }
 0x121   :  { %139 = vst [vmem:[%s3091_s18 + $0x8] sm:$0xff] %v137_v52 }
 0x122   :  { %2047 = vmatmul.msk.bf16.vlgmr.msra.gmra.mxu0 %vm74_vm0, %v140_v53 }
 0x19f   :  { %v173_v55 = vpop.f32.mrf.mxu0 }
 0x1a0   :  { %v174_v56 = vadd.f32 %v2263_v54, %v173_v55  ;;  %v2268_v55 = vld [vmem:[%s3092_s1 + $0x4] ss:$0 sm:$0xff] }
 0x1a2   :  { %v178_v57 = vpack.c.bf16 %v174_v56, %v174_v56 }
 0x1a4   :  { %190 = vrot.lane.b32.xlu1 %v178_v57, %s2391_s23  ;;  %182 = vrot.lane.b32.xlu2 %v178_v57, %s2392_s24  ;;  %v218_v63 = vunpack.c.l.b16 %v178_v57 }
 0x1a6   :  { %v2554_v0 = vpack.c.b16 %v218_v63, %v218_v63 }
 0x1a7   :  { %v175_v58 = vpop.f32.mrf.mxu0 }
 0x1a8   :  { %v176_v59 = vadd.f32 %v2263_v54, %v175_v58 }
 0x1aa   :  { %v179_v60 = vpack.c.bf16 %v176_v59, %v176_v59 }
 0x1ac   :  { %188 = vrot.lane.b32.xlu0 %v179_v60, %s2393_s25  ;;  %184 = vrot.lane.b32.xlu2 %v179_v60, %s2392_s24  ;;  %v242_v61 = vunpack.c.l.b16 %v179_v60 }
 0x1ae   :  { %v243_v62 = vpack.c.b16 %v242_v61, %v242_v61 }
 0x1b4   :  { %186 = vrot.lane.b32.xlu2 %v178_v57, %s2393_s25 }
 0x1bc   :  { %192 = vrot.lane.b32.xlu2 %v179_v60, %s2391_s23 }
 0x1c4   :  { %244 = vrot.lane.b32.xlu2 %v243_v62, %s2394_s5 }
 0x1cc   :  { %220 = vrot.lane.b32.xlu2 %v2554_v0, %s2394_s5 }
 0x1fe   :  { %v183_v1 = vpop.permute.xlu2 %182 }
 0x1ff   :  { %v265_v2 = vunpack.c.l.b16 %v183_v1 }
 0x201   :  { %v2558_v3 = vpack.c.b16 %v265_v2, %v265_v2 }
 0x203   :  { %267 = vrot.lane.b32.xlu0 %v2558_v3, %s2394_s5 }
 0x206   :  { %v185_v4 = vpop.permute.xlu2 %184 }
 0x207   :  { %v288_v5 = vunpack.c.l.b16 %v185_v4 }
 0x209   :  { %v2562_v6 = vpack.c.b16 %v288_v5, %v288_v5 }
 0x20b   :  { %290 = vrot.lane.b32.xlu1 %v2562_v6, %s2394_s5 }
 0x20e   :  { %v187_v7 = vpop.permute.xlu2 %186 }
 0x20f   :  { %v311_v8 = vunpack.c.l.b16 %v187_v7 }
 0x211   :  { %v2566_v9 = vpack.c.b16 %v311_v8, %v311_v8 }
 0x213   :  { %313 = vrot.lane.b32.xlu1 %v2566_v9, %s2394_s5 }
 0x216   :  { %v191_v11 = vpop.permute.xlu1 %190  ;;  %v193_v12 = vpop.permute.xlu2 %192 }
 0x217   :  { %v357_v13 = vunpack.c.l.b16 %v191_v11  ;;  %v380_v20 = vunpack.c.l.b16 %v193_v12 }
 0x219   :  { %v2570_v14 = vpack.c.b16 %v357_v13, %v357_v13  ;;  %v2581_v23 = vpack.c.b16 %v380_v20, %v380_v20 }
 0x21b   :  { %359 = vrot.lane.b32.xlu2 %v2570_v14, %s2394_s5 }
 0x21e   :  { %v189_v15 = vpop.permute.xlu0 %188  ;;  %v245_v16 = vpop.permute.xlu2 %244 }
 0x21f   :  { %v334_v17 = vunpack.c.l.b16 %v189_v15  ;;  %v250_v18 = vsel %vm222_vm8, %v245_v16, 0 }
 0x220   :  { %259 = vmatpush.bf16.xpose.msra.mxu2 %v250_v18 }
 0x221   :  { %v2575_v19 = vpack.c.b16 %v334_v17, %v334_v17 }
 0x223   :  { %336 = vrot.lane.b32.xlu0 %v2575_v19, %s2394_s5 }
 0x226   :  { %v221_v21 = vpop.permute.xlu2 %220 }
 0x227   :  { %2049 = vmatmul.msk.bf16.vlgmr.msra.gmra.mxu2 %vm222_vm8, %v179_v60  ;;  %v227_v22 = vsel %vm222_vm8, %v221_v21, 0  ;;  %v2267_v60 = vld [vmem:[%s3092_s1 + $0x3] ss:$0 sm:$0xff]  ;;  %v2270_v21 = vld [vmem:[%s3092_s1 + $0x5] ss:$0 sm:$0xff] }
 0x228   :  { %236 = vmatpush.bf16.xpose.msra.mxu1 %v227_v22 }
 0x22b   :  { %382 = vrot.lane.b32.xlu0 %v2581_v23, %s2394_s5 }
 0x22f   :  { %2048 = vmatmul.msk.bf16.vlgmr.msra.gmra.mxu1 %vm222_vm8, %v178_v57 }
 0x233   :  { %625 = vrot.lane.b32.xlu0 %v243_v62, %s2395_s26  ;;  %v2269_v62 = vld [vmem:[%s3092_s1 + $0x6] ss:$0 sm:$0xff] }
 0x275   :  { %v268_v24 = vpop.permute.xlu0 %267  ;;  %v360_v25 = vpop.permute.xlu2 %359 }
 0x276   :  { %v273_v26 = vsel %vm222_vm8, %v268_v24, 0  ;;  %v365_v27 = vsel %vm222_vm8, %v360_v25, 0  ;;  %v2271_v25 = vld [vmem:[%s3092_s1 + $0x7] ss:$0 sm:$0xff] }
 0x277   :  { %282 = vmatpush.bf16.xpose.msra.mxu3 %v273_v26 }
 0x27d   :  { %v291_v28 = vpop.permute.xlu1 %290 }
 0x27e   :  { %2050 = vmatmul.msk.bf16.vlgmr.msra.gmra.mxu3 %vm222_vm8, %v183_v1  ;;  %v296_v29 = vsel %vm222_vm8, %v291_v28, 0 }
 0x27f   :  { %374 = vmatpush.bf16.xpose.msrb.mxu3 %v365_v27  ;;  %305 = vmatpush.bf16.xpose.msrb.mxu0 %v296_v29 }
 0x285   :  { %v314_v30 = vpop.permute.xlu1 %313 }
 0x286   :  { %2051 = vmatmul.msk.bf16.vlgmr.msrb.gmra.mxu0 %vm222_vm8, %v185_v4  ;;  %v319_v31 = vsel %vm222_vm8, %v314_v30, 0 }
 0x287   :  { %328 = vmatpush.bf16.xpose.msrb.mxu1 %v319_v31 }
 0x28e   :  { %2052 = vmatmul.msk.bf16.vlgmr.msrb.gmra.mxu1 %vm222_vm8, %v187_v7  ;;  %2054 = vmatmul.msk.bf16.vlgmr.msrb.gmra.mxu3 %vm222_vm8, %v191_v11 }
 0x295   :  { %v337_v32 = vpop.permute.xlu0 %336 }
 0x296   :  { %v342_v33 = vsel %vm222_vm8, %v337_v32, 0 }
 0x297   :  { %351 = vmatpush.bf16.xpose.msrb.mxu2 %v342_v33 }
 0x29d   :  { %v383_v34 = vpop.permute.xlu0 %382 }
 0x29e   :  { %v388_v35 = vsel %vm222_vm8, %v383_v34, 0  ;;  %2053 = vmatmul.msk.bf16.vlgmr.msrb.gmra.mxu2 %vm222_vm8, %v189_v15 }
 0x29f   :  { %397 = vmatpush.bf16.xpose.msra.mxu0 %v388_v35 }
 0x2a5   :  { %v626_v36 = vpop.permute.xlu0 %625 }
 0x2a6   :  { %v631_v37 = vsel %vm608_vm9, %v626_v36, 0  ;;  %2055 = vmatmul.msk.bf16.vlgmr.msra.gmra.mxu0 %vm222_vm8, %v193_v12 }
 0x2a7   :  { %640 = vmatpush.bf16.msra.mxu2 %v631_v37 }
 0x2aa   :  { %v261_v40 = vpop.f32.mrf.mxu2 }
 0x2ab   :  { %v262_v41 = vadd.f32 %v2264_v38, %v261_v40 }
 0x2ac   :  { %v238_v42 = vpop.f32.mrf.mxu1 }
 0x2ad   :  { %v239_v43 = vadd.f32 %v2265_v39, %v238_v42  ;;  %v406_v44 = vsel %vm222_vm8, %v262_v41, -inf }
 0x2ae   :  { %407 = vmax.xlane.f32.xlu2 %v406_v44 }
 0x2af   :  { %v403_v46 = vsel %vm222_vm8, %v239_v43, -inf }
 0x2b0   :  { %404 = vmax.xlane.f32.xlu0 %v403_v46 }
 0x2b2   :  { %v263_v47 = vpop.f32.mrf.mxu2 }
 0x2b4   :  { %v240_v48 = vpop.f32.mrf.mxu1 }
 0x301   :  { %v284_v50 = vpop.f32.mrf.mxu3 }
 0x302   :  { %v285_v52 = vadd.f32 %v2266_v49, %v284_v50 }
 0x303   :  { %v307_v53 = vpop.f32.mrf.mxu0 }
 0x304   :  { %v409_v54 = vsel %vm222_vm8, %v285_v52, -inf  ;;  %v308_v1 = vadd.f32 %v2267_v60, %v307_v53 }
 0x305   :  { %410 = vmax.xlane.f32.xlu1 %v409_v54 }
 0x306   :  { %v412_v7 = vsel %vm222_vm8, %v308_v1, -inf }
 0x309   :  { %v286_v56 = vpop.f32.mrf.mxu3 }
 0x30b   :  { %v309_v57 = vpop.f32.mrf.mxu0  ;;  %v330_v58 = vpop.f32.mrf.mxu1 }
 0x30c   :  { %v331_v59 = vadd.f32 %v2268_v55, %v330_v58 }
 0x30e   :  { %v415_v61 = vsel %vm222_vm8, %v331_v59, -inf }
 0x30f   :  { %416 = vmax.xlane.f32.xlu2 %v415_v61 }
 0x311   :  { %v376_v63 = vpop.f32.mrf.mxu3 }
 0x312   :  { %v377_v2 = vadd.f32 %v2269_v62, %v376_v63 }
 0x313   :  { %v332_v4 = vpop.f32.mrf.mxu1 }
 0x314   :  { %v421_v5 = vsel %vm222_vm8, %v377_v2, -inf }
 0x315   :  { %422 = vmax.xlane.f32.xlu0 %v421_v5 }
 0x317   :  { %413 = vmax.xlane.f32.xlu2 %v412_v7 }
 0x319   :  { %v378_v8 = vpop.f32.mrf.mxu3 }
 0x321   :  { %v353_v11 = vpop.f32.mrf.mxu2  ;;  %v408_v27 = vpop.xlane.xlu2 %407 }
 0x322   :  { %v354_v24 = vadd.f32 %v2270_v21, %v353_v11 }
 0x323   :  { %v399_v12 = vpop.f32.mrf.mxu0  ;;  %v405_v13 = vpop.xlane.xlu0 %404 }
 0x324   :  { %v427_v15 = vsub.f32 %v239_v43, %v405_v13  ;;  %v2639_v26 = vadd.f32 %v2271_v25, %v399_v12 }
 0x326   :  { %v435_v16 = vmul.f32 1.442695, %v427_v15  ;;  %v424_v28 = vsel %vm222_vm8, %v2639_v26, -inf }
 0x328   :  { %2294 = vpow2.f32 %v435_v16 }
 0x329   :  { %v355_v17 = vpop.f32.mrf.mxu2  ;;  %603 = vrot.lane.b32.xlu0 %v2554_v0, %s2395_s26  ;;  %v418_v0 = vsel %vm222_vm8, %v354_v24, -inf }
 0x32b   :  { %v401_v18 = vpop.f32.mrf.mxu0 }
 0x32e   :  { %v2626_v20 = vpop.eup %2294 }
 0x32f   :  { %646 = vrot.lane.b32.xlu2 %v2558_v3, %s2395_s26  ;;  %v451_v22 = vsel %vm222_vm8, %v2626_v20, 0.0  ;;  %v428_v3 = vsub.f32 %v262_v41, %v408_v27 }
 0x330   :  { %452 = vadd.xlane.f32.xlu1 %v451_v22 }
 0x331   :  { %v437_v29 = vmul.f32 1.442695, %v428_v3 }
 0x333   :  { %2296 = vpow2.f32 %v437_v29 }
 0x338   :  { %419 = vmax.xlane.f32.xlu1 %v418_v0 }
 0x339   :  { %v2643_v30 = vpop.eup %2296 }
 0x33a   :  { %v454_v31 = vsel %vm222_vm8, %v2643_v30, 0.0 }
 0x340   :  { %425 = vmax.xlane.f32.xlu1 %v424_v28 }
 0x353   :  { %455 = vadd.xlane.f32.xlu0 %v454_v31 }
 0x378   :  { %v411_v32 = vpop.xlane.xlu1 %410 }
 0x379   :  { %v429_v33 = vsub.f32 %v285_v52, %v411_v32 }
 0x37b   :  { %v439_v34 = vmul.f32 1.442695, %v429_v33 }
 0x37d   :  { %2298 = vpow2.f32 %v439_v34 }
 0x382   :  { %v417_v35 = vpop.xlane.xlu2 %416 }
 0x383   :  { %v2647_v36 = vpop.eup %2298  ;;  %v431_v37 = vsub.f32 %v331_v59, %v417_v35 }
 0x384   :  { %v457_v38 = vsel %vm222_vm8, %v2647_v36, 0.0 }
 0x385   :  { %v443_v39 = vmul.f32 1.442695, %v431_v37  ;;  %458 = vadd.xlane.f32.xlu2 %v457_v38 }
 0x387   :  { %2300 = vpow2.f32 %v443_v39 }
 0x388   :  { %v423_v40 = vpop.xlane.xlu0 %422 }
 0x389   :  { %v433_v41 = vsub.f32 %v377_v2, %v423_v40 }
 0x38a   :  { %v414_v42 = vpop.xlane.xlu2 %413 }
 0x38b   :  { %v447_v43 = vmul.f32 1.442695, %v433_v41  ;;  %v430_v44 = vsub.f32 %v308_v1, %v414_v42 }
 0x38d   :  { %v2651_v46 = vpop.eup %2300  ;;  %2302 = vpow2.f32 %v447_v43  ;;  %v441_v47 = vmul.f32 1.442695, %v430_v44 }
 0x38e   :  { %v463_v48 = vsel %vm222_vm8, %v2651_v46, 0.0 }
 0x38f   :  { %2304 = vpow2.f32 %v441_v47  ;;  %464 = vadd.xlane.f32.xlu1 %v463_v48 }
 0x392   :  { %v647_v49 = vpop.permute.xlu2 %646 }
 0x393   :  { %v2655_v50 = vpop.eup %2302  ;;  %v652_v52 = vsel %vm608_vm9, %v647_v49, 0 }
 0x394   :  { %661 = vmatpush.bf16.msra.mxu3 %v652_v52  ;;  %v469_v54 = vsel %vm222_vm8, %v2655_v50, 0.0 }
 0x395   :  { %v2658_v53 = vpop.eup %2304 }
 0x396   :  { %v460_v55 = vsel %vm222_vm8, %v2658_v53, 0.0 }
 0x397   :  { %470 = vadd.xlane.f32.xlu1 %v469_v54  ;;  %461 = vadd.xlane.f32.xlu0 %v460_v55 }
 0x39b   :  { %v604_v56 = vpop.permute.xlu0 %603 }
 0x39c   :  { %v610_v57 = vsel %vm608_vm9, %v604_v56, 0 }
 0x39d   :  { %619 = vmatpush.bf16.msra.mxu1 %v610_v57 }
 0x3a3   :  { %v453_v58 = vpop.xlane.xlu1 %452 }
 0x3a4   :  { %2306 = vrcp.f32 %v453_v58  ;;  %v486_v1 = vand.u32 2147483648, %v453_v58  ;;  %v484_v5 = vand.u32 2147483647, %v453_v58  ;;  %vm480_vm11 = vweird.f32 %v453_v58 }
 0x3a6   :  { %v487_v8 = vor.u32 1.1754944e-38, %v486_v1  ;;  %vm485_vm13 = vcmp.eq.f32.partialorder %v484_v5, 8.507059e+37 }
 0x3aa   :  { %v2307_v59 = vpop.eup %2306 }
 0x3ab   :  { %v476_v60 = vmul.f32 %v2307_v59, %v453_v58  ;;  %v420_v61 = vpop.xlane.xlu1 %419  ;;  %730 = vrot.lane.b32.xlu0 %v2570_v14, %s2395_s26  ;;  %vm481_vm10 = vweird.f32 %v2307_v59 }
 0x3ac   :  { %v432_v62 = vsub.f32 %v354_v24, %v420_v61  ;;  %vm482_vm12 = vmor %vm480_vm11, %vm481_vm10 }
 0x3ad   :  { %v477_v63 = vsub.f32 1.0, %v476_v60 }
 0x3ae   :  { %v445_v2 = vmul.f32 1.442695, %v432_v62 }
 0x3af   :  { %v478_v4 = vmul.f32 %v2307_v59, %v477_v63 }
 0x3b0   :  { %2308 = vpow2.f32 %v445_v2 }
 0x3b1   :  { %v479_v7 = vadd.f32 %v2307_v59, %v478_v4 }
 0x3b3   :  { %v483_v11 = vsel %vm482_vm12, %v2307_v59, %v479_v7  ;;  %v426_v12 = vpop.xlane.xlu1 %425  ;;  %751 = vrot.lane.b32.xlu0 %v2581_v23, %s2395_s26 }
 0x3b4   :  { %v488_v13 = vsel %vm485_vm13, %v487_v8, %v483_v11  ;;  %v434_v14 = vsub.f32 %v2639_v26, %v426_v12 }
 0x3b5   :  { %v489_v15 = vmul.f32 %v2626_v20, %v488_v13 }
 0x3b6   :  { %v2671_v16 = vpop.eup %2308  ;;  %v449_v17 = vmul.f32 1.442695, %v434_v14 }
 0x3b7   :  { %v466_v18 = vsel %vm222_vm8, %v2671_v16, 0.0  ;;  %v595_v21 = vpack.c.bf16 %v489_v15, %v489_v15 }
 0x3b8   :  { %2310 = vpow2.f32 %v449_v17  ;;  %467 = vadd.xlane.f32.xlu2 %v466_v18 }
 0x3b9   :  { %2056 = vmatmul.msk.bf16.vlgmr.msra.gmra.mxu1 %vm222_vm8, %v595_v21 }
 0x3be   :  { %v2676_v22 = vpop.eup %2310 }
 0x3bf   :  { %v472_v23 = vsel %vm222_vm8, %v2676_v22, 0.0 }
 0x3c0   :  { %473 = vadd.xlane.f32.xlu1 %v472_v23 }
 0x3c6   :  { %v456_v24 = vpop.xlane.xlu0 %455 }
 0x3c7   :  { %2312 = vrcp.f32 %v456_v24  ;;  %v501_v26 = vand.u32 2147483648, %v456_v24  ;;  %v499_v28 = vand.u32 2147483647, %v456_v24  ;;  %vm495_vm15 = vweird.f32 %v456_v24 }
 0x3c9   :  { %v502_v29 = vor.u32 1.1754944e-38, %v501_v26  ;;  %vm500_vm2 = vcmp.eq.f32.partialorder %v499_v28, 8.507059e+37 }
 0x3cd   :  { %v2313_v20 = vpop.eup %2312 }
 0x3ce   :  { %v491_v25 = vmul.f32 %v2313_v20, %v456_v24  ;;  %vm496_vm14 = vweird.f32 %v2313_v20 }
 0x3cf   :  { %vm497_vm1 = vmor %vm495_vm15, %vm496_vm14 }
 0x3d0   :  { %v492_v0 = vsub.f32 1.0, %v491_v25  ;;  %709 = vrot.lane.b32.xlu2 %v2575_v19, %s2395_s26 }
 0x3d2   :  { %v493_v27 = vmul.f32 %v2313_v20, %v492_v0 }
 0x3d4   :  { %v494_v3 = vadd.f32 %v2313_v20, %v493_v27 }
 0x3d6   :  { %v498_v31 = vsel %vm497_vm1, %v2313_v20, %v494_v3 }
 0x3d7   :  { %v503_v32 = vsel %vm500_vm2, %v502_v29, %v498_v31 }
 0x3d8   :  { %v504_v33 = vmul.f32 %v2643_v30, %v503_v32  ;;  %688 = vrot.lane.b32.xlu2 %v2566_v9, %s2395_s26 }
 0x3d9   :  { %667 = vrot.lane.b32.xlu1 %v2562_v6, %s2395_s26 }
 0x3da   :  { %v596_v19 = vpack.c.bf16 %v504_v33, %v504_v33 }
 0x3dc   :  { %2057 = vmatmul.msk.bf16.vlgmr.msra.gmra.mxu2 %vm222_vm8, %v596_v19 }
 0x3f8   :  { %v459_v34 = vpop.xlane.xlu2 %458 }
 0x3f9   :  { %2314 = vrcp.f32 %v459_v34  ;;  %v516_v40 = vand.u32 2147483648, %v459_v34  ;;  %v514_v42 = vand.u32 2147483647, %v459_v34  ;;  %vm510_vm4 = vweird.f32 %v459_v34 }
 0x3fb   :  { %v517_v9 = vor.u32 1.1754944e-38, %v516_v40  ;;  %vm515_vm6 = vcmp.eq.f32.partialorder %v514_v42, 8.507059e+37 }
 0x3ff   :  { %v2315_v35 = vpop.eup %2314 }
 0x400   :  { %v506_v37 = vmul.f32 %v2315_v35, %v459_v34  ;;  %vm511_vm3 = vweird.f32 %v2315_v35 }
 0x401   :  { %vm512_vm5 = vmor %vm510_vm4, %vm511_vm3 }
 0x402   :  { %v507_v38 = vsub.f32 1.0, %v506_v37  ;;  %v465_v39 = vpop.xlane.xlu1 %464 }
 0x403   :  { %v546_v14 = vand.u32 2147483648, %v465_v39  ;;  %vm540_vm14 = vweird.f32 %v465_v39  ;;  %v544_v15 = vand.u32 2147483647, %v465_v39 }
 0x404   :  { %v508_v41 = vmul.f32 %v2315_v35, %v507_v38 }
 0x405   :  { %v547_v24 = vor.u32 1.1754944e-38, %v546_v14  ;;  %vm545_vm1 = vcmp.eq.f32.partialorder %v544_v15, 8.507059e+37 }
 0x406   :  { %v509_v30 = vadd.f32 %v2315_v35, %v508_v41 }
 0x408   :  { %v513_v43 = vsel %vm512_vm5, %v2315_v35, %v509_v30 }
 0x409   :  { %v518_v6 = vsel %vm515_vm6, %v517_v9, %v513_v43 }
 0x40a   :  { %v519_v44 = vmul.f32 %v2647_v36, %v518_v6  ;;  %v471_v47 = vpop.xlane.xlu1 %470  ;;  %v2690_v56 = vpop.xlane.xlu0 %461 }
 0x40b   :  { %2316 = vrcp.f32 %v471_v47  ;;  %v576_v55 = vand.u32 2147483648, %v471_v47  ;;  %v574_v58 = vand.u32 2147483647, %v471_v47  ;;  %vm570_vm10 = vweird.f32 %v471_v47 }
 0x40c   :  { %v597_v48 = vpack.c.bf16 %v519_v44, %v519_v44  ;;  %2318 = vrcp.f32 %v465_v39  ;;  %v531_v43 = vand.u32 2147483648, %v2690_v56  ;;  %v529_v6 = vand.u32 2147483647, %v2690_v56 }
 0x40d   :  { %v577_v60 = vor.u32 1.1754944e-38, %v576_v55  ;;  %vm575_vm12 = vcmp.eq.f32.partialorder %v574_v58, 8.507059e+37  ;;  %2320 = vrcp.f32 %v2690_v56 }
 0x40e   :  { %2058 = vmatmul.msk.bf16.vlgmr.msra.gmra.mxu3 %vm222_vm8, %v597_v48 }
 0x411   :  { %v2317_v49 = vpop.eup %2316 }
 0x412   :  { %v566_v52 = vmul.f32 %v2317_v49, %v471_v47  ;;  %vm571_vm7 = vweird.f32 %v2317_v49  ;;  %v2319_v4 = vpop.eup %2318  ;;  %v532_v47 = vor.u32 1.1754944e-38, %v531_v43 }
 0x413   :  { %vm572_vm11 = vmor %vm570_vm10, %vm571_vm7  ;;  %v536_v5 = vmul.f32 %v2319_v4, %v465_v39  ;;  %vm541_vm13 = vweird.f32 %v2319_v4  ;;  %v2321_v13 = vpop.eup %2320  ;;  %vm525_vm7 = vweird.f32 %v2690_v56 }
 0x414   :  { %v567_v54 = vsub.f32 1.0, %v566_v52  ;;  %vm542_vm15 = vmor %vm540_vm14, %vm541_vm13  ;;  %v521_v23 = vmul.f32 %v2321_v13, %v2690_v56  ;;  %vm526_vm6 = vweird.f32 %v2321_v13 }
 0x415   :  { %v537_v7 = vsub.f32 1.0, %v536_v5  ;;  %vm527_vm10 = vmor %vm525_vm7, %vm526_vm6 }
 0x416   :  { %v568_v57 = vmul.f32 %v2317_v49, %v567_v54  ;;  %v522_v29 = vsub.f32 1.0, %v521_v23 }
 0x417   :  { %v538_v11 = vmul.f32 %v2319_v4, %v537_v7 }
 0x418   :  { %v569_v59 = vadd.f32 %v2317_v49, %v568_v57  ;;  %v523_v37 = vmul.f32 %v2321_v13, %v522_v29 }
 0x419   :  { %v539_v12 = vadd.f32 %v2319_v4, %v538_v11 }
 0x41a   :  { %v573_v61 = vsel %vm572_vm11, %v2317_v49, %v569_v59  ;;  %v524_v9 = vadd.f32 %v2321_v13, %v523_v37  ;;  %vm530_vm11 = vcmp.eq.f32.partialorder %v529_v6, 8.507059e+37 }
 0x41b   :  { %v578_v36 = vsel %vm575_vm12, %v577_v60, %v573_v61  ;;  %v543_v21 = vsel %vm542_vm15, %v2319_v4, %v539_v12 }
 0x41c   :  { %v579_v62 = vmul.f32 %v2655_v50, %v578_v36  ;;  %v548_v27 = vsel %vm545_vm1, %v547_v24, %v543_v21  ;;  %v528_v44 = vsel %vm527_vm10, %v2321_v13, %v524_v9  ;;  %vm798_vm1 = vcmask 130048  }
 0x41d   :  { %v731_v63 = vpop.permute.xlu0 %730  ;;  %v549_v33 = vmul.f32 %v2651_v46, %v548_v27  ;;  %v533_v48 = vsel %vm530_vm11, %v532_v47, %v528_v44  ;;  %vm993_vm11 = vcmask 523264  }
 0x41e   :  { %v736_v1 = vsel %vm608_vm9, %v731_v63, 0  ;;  %v601_v2 = vpack.c.bf16 %v579_v62, %v579_v62  ;;  %v534_v52 = vmul.f32 %v2658_v53, %v533_v48 }
 0x41f   :  { %745 = vmatpush.bf16.msrb.mxu3 %v736_v1  ;;  %v599_v42 = vpack.c.bf16 %v549_v33, %v549_v33 }
 0x420   :  { %v598_v60 = vpack.c.bf16 %v534_v52, %v534_v52 }
 0x422   :  { %2062 = vmatmul.msk.bf16.vlgmr.msrb.gmra.mxu3 %vm222_vm8, %v601_v2 }
 0x425   :  { %v752_v54 = vpop.permute.xlu0 %751 }
 0x426   :  { %v757_v59 = vsel %vm608_vm9, %v752_v54, 0 }
 0x42b   :  { %v468_v8 = vpop.xlane.xlu2 %467 }
 0x42c   :  { %2322 = vrcp.f32 %v468_v8  ;;  %v561_v0 = vand.u32 2147483648, %v468_v8  ;;  %v559_v3 = vand.u32 2147483647, %v468_v8  ;;  %vm555_vm3 = vweird.f32 %v468_v8 }
 0x42e   :  { %v562_v19 = vor.u32 1.1754944e-38, %v561_v0  ;;  %vm560_vm5 = vcmp.eq.f32.partialorder %v559_v3, 8.507059e+37  ;;  %v2202_v0 = vld [vmem:[%s3094_s6] sm:$0xff] }
 0x432   :  { %v2323_v50 = vpop.eup %2322 }
 0x433   :  { %v551_v17 = vmul.f32 %v2323_v50, %v468_v8  ;;  %v710_v18 = vpop.permute.xlu2 %709  ;;  %vm556_vm2 = vweird.f32 %v2323_v50  ;;  %v474_v31 = vpop.xlane.xlu1 %473 }
 0x434   :  { %v715_v25 = vsel %vm608_vm9, %v710_v18, 0  ;;  %vm557_vm4 = vmor %vm555_vm3, %vm556_vm2  ;;  %2324 = vrcp.f32 %v474_v31  ;;  %v591_v61 = vand.u32 2147483648, %v474_v31  ;;  %vm585_vm13 = vweird.f32 %v474_v31 }
 0x435   :  { %v552_v20 = vsub.f32 1.0, %v551_v17  ;;  %724 = vmatpush.bf16.msrb.mxu2 %v715_v25  ;;  %v589_v36 = vand.u32 2147483647, %v474_v31  ;;  %v2203_v25 = vld [vmem:[%s3094_s6 + $0x8] sm:$0xff]  ;;  %vm801_vm2 = vcmask 195584  }
 0x436   :  { %v2698_v26 = vpop.f32.mrf.mxu1  ;;  %v592_v53 = vor.u32 1.1754944e-38, %v591_v61 }
 0x437   :  { %v553_v28 = vmul.f32 %v2323_v50, %v552_v20  ;;  %vm590_vm15 = vcmp.eq.f32.partialorder %v589_v36, 8.507059e+37 }
 0x439   :  { %v554_v32 = vadd.f32 %v2323_v50, %v553_v28 }
 0x43a   :  { %v2325_v46 = vpop.eup %2324 }
 0x43b   :  { %v558_v34 = vsel %vm557_vm4, %v2323_v50, %v554_v32  ;;  %v689_v35 = vpop.permute.xlu2 %688  ;;  %vm586_vm12 = vweird.f32 %v2325_v46 }
 0x43c   :  { %v563_v38 = vsel %vm560_vm5, %v562_v19, %v558_v34  ;;  %v694_v39 = vsel %vm608_vm9, %v689_v35, 0  ;;  %vm587_vm14 = vmor %vm585_vm13, %vm586_vm12 }
 0x43d   :  { %v564_v40 = vmul.f32 %v2671_v16, %v563_v38  ;;  %703 = vmatpush.bf16.msrb.mxu1 %v694_v39  ;;  %v581_v16 = vmul.f32 %v2325_v46, %v474_v31 }
 0x43e   :  { %v623_v41 = vpop.f32.mrf.mxu1 }
 0x43f   :  { %v600_v30 = vpack.c.bf16 %v564_v40, %v564_v40  ;;  %v582_v49 = vsub.f32 1.0, %v581_v16 }
 0x440   :  { %2060 = vmatmul.msk.bf16.vlgmr.msrb.gmra.mxu1 %vm222_vm8, %v599_v42 }
 0x441   :  { %2061 = vmatmul.msk.bf16.vlgmr.msrb.gmra.mxu2 %vm222_vm8, %v600_v30  ;;  %v583_v57 = vmul.f32 %v2325_v46, %v582_v49  ;;  %834 = vmatpush.bf16.msra.mxu1 %v2203_v25  ;;  %v2272_v30 = vld [vmem:[%s3093_s7] ss:$0 sm:$0xff] }
 0x443   :  { %v584_v56 = vadd.f32 %v2325_v46, %v583_v57 }
 0x445   :  { %v588_v62 = vsel %vm587_vm14, %v2325_v46, %v584_v56  ;;  %835 = vmatpush.bf16.msra.mxu1 %v2202_v0  ;;  %v2205_v56 = vld [vmem:[%s3098_s10 + $0x8] sm:$0xff] }
 0x446   :  { %v593_v63 = vsel %vm590_vm15, %v592_v53, %v588_v62  ;;  %930 = vmatpush.bf16.msra.mxu2 %v2205_v56  ;;  %v2204_v62 = vld [vmem:[%s3098_s10] sm:$0xff] }
 0x447   :  { %v594_v1 = vmul.f32 %v2676_v22, %v593_v63 }
 0x449   :  { %v602_v2 = vpack.c.bf16 %v594_v1, %v594_v1 }
 0x44a   :  { %931 = vmatpush.bf16.msra.mxu2 %v2204_v62 }
 0x44b   :  { %v668_v55 = vpop.permute.xlu1 %667 }
 0x44c   :  { %v673_v58 = vsel %vm608_vm9, %v668_v55, 0 }
 0x44d   :  { %682 = vmatpush.bf16.msrb.mxu0 %v673_v58 }
 0x450   :  { %2059 = vmatmul.msk.bf16.vlgmr.msrb.gmra.mxu0 %vm222_vm8, %v598_v60 }
 0x451   :  { %766 = vmatpush.bf16.msra.mxu0 %v757_v59 }
 0x45f   :  { %v642_v4 = vpop.f32.mrf.mxu2 }
 0x460   :  { %2063 = vmatmul.msk.bf16.vlgmr.msra.gmra.mxu0 %vm222_vm8, %v602_v2 }
 0x467   :  { %v644_v5 = vpop.f32.mrf.mxu2 }
 0x491   :  { %v663_v7 = vpop.f32.mrf.mxu3 }
 0x499   :  { %v665_v8 = vpop.f32.mrf.mxu3 }
 0x4a5   :  { %v747_v11 = vpop.f32.mrf.mxu3 }
 0x4ad   :  { %v749_v12 = vpop.f32.mrf.mxu3 }
 0x4bd   :  { %v705_v13 = vpop.f32.mrf.mxu1 }
 0x4c4   :  { %v726_v14 = vpop.f32.mrf.mxu2 }
 0x4c5   :  { %v2236_v50 = vpack.i.bf16 %v726_v14, %v705_v13  ;;  %v707_v15 = vpop.f32.mrf.mxu1 }
 0x4c7   :  { %2237 = vrot.lane.b32.xlu0 %v2236_v50, %s3110_s2 }
 0x4cc   :  { %v728_v17 = vpop.f32.mrf.mxu2 }
 0x4cd   :  { %v684_v18 = vpop.f32.mrf.mxu0 }
 0x4ce   :  { %v2231_v21 = vpack.i.bf16 %v684_v18, %v663_v7  ;;  %v2273_v18 = vld [vmem:[%s3095_s8] ss:$0 sm:$0xff] }
 0x4d0   :  { %2232 = vrot.lane.b32.xlu2 %v2231_v21, %s3109_s22 }
 0x4d5   :  { %v686_v22 = vpop.f32.mrf.mxu0 }
 0x4dd   :  { %v768_v23 = vpop.f32.mrf.mxu0 }
 0x4de   :  { %v2241_v24 = vpack.i.bf16 %v768_v23, %v747_v11 }
 0x4e0   :  { %2242 = vrot.lane.b32.xlu1 %v2241_v24, %s3108_s27  ;;  %v2274_v24 = vld [vmem:[%s3096_s9] ss:$0 sm:$0xff] }
 0x4e5   :  { %v770_v20 = vpop.f32.mrf.mxu0 }
 0x52a   :  { %v2233_v27 = vpop.permute.xlu2 %2232 }
 0x52b   :  { %v2235_v3 = vunpack.i.h.bf16 %v2233_v27  ;;  %v2234_v29 = vunpack.i.l.bf16 %v2233_v27 }
 0x52d   :  { %v797_v19 = vsel %vm222_vm8, %v642_v4, %v2235_v3  ;;  %v796_v34 = vsel %vm222_vm8, %v2698_v26, %v2234_v29  ;;  %v2209_v29 = vld [vmem:[%s3100_s12 + $0x18] sm:$0xff] }
 0x52e   :  { %1001 = vmatpush.bf16.msra.mxu3 %v2209_v29  ;;  %v2277_v29 = vld [vmem:[%s3101_s14] ss:$0 sm:$0xff] }
 0x539   :  { %v2238_v28 = vpop.permute.xlu0 %2237 }
 0x53a   :  { %v2240_v31 = vunpack.i.h.bf16 %v2238_v28  ;;  %v2239_v32 = vunpack.i.l.bf16 %v2238_v28 }
 0x53c   :  { %v799_v38 = vsel %vm798_vm1, %v796_v34, %v2239_v32  ;;  %v800_v39 = vsel %vm798_vm1, %v797_v19, %v2240_v31  ;;  %v2208_v31 = vld [vmem:[%s3100_s12 + $0x10] sm:$0xff]  ;;  %v2275_v32 = vld [vmem:[%s3097_s11] ss:$0 sm:$0xff] }
 0x53d   :  { %1002 = vmatpush.bf16.msra.mxu3 %v2208_v31 }
 0x552   :  { %v2243_v33 = vpop.permute.xlu1 %2242 }
 0x553   :  { %v2245_v35 = vunpack.i.h.bf16 %v2243_v33  ;;  %v2244_v37 = vunpack.i.l.bf16 %v2243_v33  ;;  %v2207_v33 = vld [vmem:[%s3100_s12 + $0x8] sm:$0xff] }
 0x554   :  { %1003 = vmatpush.bf16.msra.mxu3 %v2207_v33  ;;  %v2278_v33 = vld [vmem:[%s3102_s15] ss:$0 sm:$0xff] }
 0x555   :  { %v802_v40 = vsel %vm801_vm2, %v799_v38, %v2244_v37  ;;  %v803_v41 = vsel %vm801_vm2, %v800_v39, %v2245_v35  ;;  %v2206_v35 = vld [vmem:[%s3100_s12] sm:$0xff] }
 0x556   :  { %v804_v42 = vpack.c.bf16 %v803_v41, %v802_v40 }
 0x558   :  { %2072 = vmatmul.msk.bf16.vlgmr.msra.gmra.mxu1 %vm74_vm0, %v804_v42  ;;  %1004 = vmatpush.bf16.msra.mxu3 %v2206_v35 }
 0x5d5   :  { %v837_v9 = vpop.f32.mrf.mxu1 }
 0x5d6   :  { %v838_v46 = vadd.f32 %v2272_v30, %v837_v9 }
 0x5d8   :  { %v842_v26 = vadd.f32 %v838_v46, %v2527_v45 }
 0x5da   :  { %v846_v43 = vsel %vm74_vm0, %v842_v26, 0.0 }
 0x5db   :  { %847 = vadd.xlane.f32.xlu2 %v846_v43 }
 0x5dd   :  { %v839_v6 = vpop.f32.mrf.mxu1 }
 0x5de   :  { %v840_v44 = vadd.f32 %v2272_v30, %v839_v6 }
 0x5e0   :  { %v843_v16 = vadd.f32 %v840_v44, %v2534_v51 }
 0x5e2   :  { %v849_v47 = vsel %vm74_vm0, %v843_v16, 0.0 }
 0x5e3   :  { %850 = vadd.xlane.f32.xlu0 %v849_v47 }
 0x64e   :  { %v848_v48 = vpop.xlane.xlu2 %847 }
 0x64f   :  { %v852_v49 = vmul.f32 %v848_v48, %v2507_v10 }
 0x651   :  { %v854_v52 = vsub.f32 %v842_v26, %v852_v49 }
 0x653   :  { %v856_v54 = vmul.f32 %v854_v52, %v854_v52 }
 0x655   :  { %v858_v55 = vsel %vm74_vm0, %v856_v54, 0.0 }
 0x656   :  { %v851_v57 = vpop.xlane.xlu0 %850  ;;  %859 = vadd.xlane.f32.xlu1 %v858_v55 }
 0x657   :  { %v853_v45 = vmul.f32 %v851_v57, %v2507_v10 }
 0x659   :  { %v855_v58 = vsub.f32 %v843_v16, %v853_v45  ;;  %v2276_v45 = vld [vmem:[%s3099_s13] ss:$0 sm:$0xff] }
 0x65b   :  { %v857_v59 = vmul.f32 %v855_v58, %v855_v58 }
 0x65d   :  { %v861_v60 = vsel %vm74_vm0, %v857_v59, 0.0 }
 0x65e   :  { %862 = vadd.xlane.f32.xlu2 %v861_v60 }
 0x6c9   :  { %v860_v51 = vpop.xlane.xlu1 %859 }
 0x6ca   :  { %v864_v61 = vmul.f32 %v860_v51, %v2507_v10 }
 0x6cc   :  { %v866_v36 = vadd.f32 1e-12, %v864_v61 }
 0x6ce   :  { %2326 = vrsqrt.f32 %v866_v36  ;;  %vm874_vm4 = vweird.f32 %v866_v36 }
 0x6d1   :  { %v863_v53 = vpop.xlane.xlu2 %862 }
 0x6d2   :  { %v865_v63 = vmul.f32 %v863_v53, %v2507_v10 }
 0x6d4   :  { %v2327_v1 = vpop.eup %2326  ;;  %v867_v2 = vadd.f32 1e-12, %v865_v63 }
 0x6d5   :  { %v869_v4 = vmul.f32 %v2327_v1, %v866_v36  ;;  %vm875_vm3 = vweird.f32 %v2327_v1 }
 0x6d6   :  { %2328 = vrsqrt.f32 %v867_v2  ;;  %vm876_vm5 = vmor %vm874_vm4, %vm875_vm3  ;;  %vm884_vm7 = vweird.f32 %v867_v2 }
 0x6d7   :  { %v870_v5 = vmul.f32 %v2327_v1, %v869_v4 }
 0x6d9   :  { %v871_v7 = vmul.f32 0.5, %v870_v5 }
 0x6db   :  { %v872_v8 = vsub.f32 1.5, %v871_v7 }
 0x6dc   :  { %v2329_v11 = vpop.eup %2328 }
 0x6dd   :  { %v873_v12 = vmul.f32 %v2327_v1, %v872_v8  ;;  %v879_v13 = vmul.f32 %v2329_v11, %v867_v2  ;;  %vm885_vm6 = vweird.f32 %v2329_v11 }
 0x6de   :  { %vm886_vm10 = vmor %vm884_vm7, %vm885_vm6 }
 0x6df   :  { %v880_v14 = vmul.f32 %v2329_v11, %v879_v13  ;;  %v877_v50 = vsel %vm876_vm5, %v2327_v1, %v873_v12 }
 0x6e0   :  { %v888_v21 = vmul.f32 %v877_v50, %v854_v52 }
 0x6e1   :  { %v881_v15 = vmul.f32 0.5, %v880_v14  ;;  %v2211_v14 = vld [vmem:[%s3090_s4 + $0x18] sm:$0xff] }
 0x6e2   :  { %v893_v20 = vmul.f32 %v2273_v18, %v888_v21  ;;  %1106 = vmatpush.bf16.msrb.mxu0 %v2211_v14 }
 0x6e3   :  { %v882_v17 = vsub.f32 1.5, %v881_v15 }
 0x6e4   :  { %v898_v27 = vadd.f32 %v2274_v24, %v893_v20 }
 0x6e5   :  { %v883_v22 = vmul.f32 %v2329_v11, %v882_v17  ;;  %v2210_v17 = vld [vmem:[%s3090_s4 + $0x10] sm:$0xff] }
 0x6e6   :  { %1107 = vmatpush.bf16.msrb.mxu0 %v2210_v17 }
 0x6e7   :  { %v887_v23 = vsel %vm886_vm10, %v2329_v11, %v883_v22 }
 0x6e8   :  { %v889_v25 = vmul.f32 %v887_v23, %v855_v58 }
 0x6ea   :  { %v894_v0 = vmul.f32 %v2273_v18, %v889_v25 }
 0x6ec   :  { %v899_v28 = vadd.f32 %v2274_v24, %v894_v0 }
 0x6ee   :  { %v900_v3 = vpack.c.bf16 %v899_v28, %v898_v27 }
 0x6f0   :  { %2081 = vmatmul.msk.bf16.vlgmr.msra.gmra.mxu2 %vm74_vm0, %v900_v3 }
 0x773   :  { %v933_v19 = vpop.f32.mrf.mxu2 }
 0x774   :  { %v934_v34 = vadd.f32 %v2275_v32, %v933_v19 }
 0x776   :  { %v938_v37 = vmul.f32 %v934_v34, %v934_v34 }
 0x778   :  { %v940_v38 = vmul.f32 %v938_v37, %v934_v34 }
 0x77a   :  { %v942_v39 = vmul.f32 0.044715, %v940_v38 }
 0x77b   :  { %v935_v40 = vpop.f32.mrf.mxu2 }
 0x77c   :  { %v944_v41 = vadd.f32 %v942_v39, %v934_v34  ;;  %v936_v42 = vadd.f32 %v2275_v32, %v935_v40 }
 0x77e   :  { %v946_v30 = vmul.f32 0.7978846, %v944_v41  ;;  %v939_v9 = vmul.f32 %v936_v42, %v936_v42 }
 0x780   :  { %v941_v46 = vmul.f32 %v939_v9, %v936_v42  ;;  %2330 = vtanh.f32 %v946_v30 }
 0x782   :  { %v943_v26 = vmul.f32 0.044715, %v941_v46 }
 0x784   :  { %v945_v43 = vadd.f32 %v943_v26, %v936_v42 }
 0x786   :  { %v947_v6 = vmul.f32 0.7978846, %v945_v43  ;;  %v2331_v44 = vpop.eup %2330  ;;  %v2279_v43 = vld [vmem:[%s3118_s3 + $0x1] ss:$0 sm:$0xff] }
 0x787   :  { %v950_v16 = vadd.f32 1.0, %v2331_v44 }
 0x788   :  { %2332 = vtanh.f32 %v947_v6 }
 0x789   :  { %v952_v48 = vmul.f32 0.5, %v950_v16 }
 0x78b   :  { %v954_v54 = vmul.f32 %v952_v48, %v934_v34 }
 0x78e   :  { %v2333_v47 = vpop.eup %2332 }
 0x78f   :  { %v951_v49 = vadd.f32 1.0, %v2333_v47 }
 0x791   :  { %v953_v52 = vmul.f32 0.5, %v951_v49 }
 0x793   :  { %v955_v55 = vmul.f32 %v953_v52, %v936_v42 }
 0x795   :  { %v956_v57 = vpack.c.bf16 %v955_v55, %v954_v54 }
 0x797   :  { %2098 = vmatmul.msk.bf16.vlgmr.msra.gmra.mxu3 %vm993_vm11, %v956_v57 }
 0x81a   :  { %v1006_v58 = vpop.f32.mrf.mxu3 }
 0x81b   :  { %v1007_v59 = vadd.f32 %v2276_v45, %v1006_v58 }
 0x81d   :  { %v1011_v60 = vadd.f32 %v1007_v59, %v898_v27 }
 0x81f   :  { %v1015_v51 = vsel %vm74_vm0, %v1011_v60, 0.0 }
 0x820   :  { %1016 = vadd.xlane.f32.xlu0 %v1015_v51 }
 0x822   :  { %v1008_v56 = vpop.f32.mrf.mxu3 }
 0x823   :  { %v1009_v61 = vadd.f32 %v2276_v45, %v1008_v56 }
 0x825   :  { %v1012_v36 = vadd.f32 %v1009_v61, %v899_v28 }
 0x827   :  { %v1018_v62 = vsel %vm74_vm0, %v1012_v36, 0.0 }
 0x828   :  { %1019 = vadd.xlane.f32.xlu1 %v1018_v62 }
 0x893   :  { %v1017_v53 = vpop.xlane.xlu0 %1016 }
 0x894   :  { %v1021_v63 = vmul.f32 %v1017_v53, %v2507_v10 }
 0x896   :  { %v1023_v1 = vsub.f32 %v1011_v60, %v1021_v63 }
 0x898   :  { %v1025_v2 = vmul.f32 %v1023_v1, %v1023_v1 }
 0x89a   :  { %v1027_v4 = vsel %vm74_vm0, %v1025_v2, 0.0 }
 0x89b   :  { %v1020_v5 = vpop.xlane.xlu1 %1019  ;;  %1028 = vadd.xlane.f32.xlu2 %v1027_v4 }
 0x89c   :  { %v1022_v7 = vmul.f32 %v1020_v5, %v2507_v10 }
 0x89e   :  { %v1024_v8 = vsub.f32 %v1012_v36, %v1022_v7 }
 0x8a0   :  { %v1026_v11 = vmul.f32 %v1024_v8, %v1024_v8 }
 0x8a2   :  { %v1030_v12 = vsel %vm74_vm0, %v1026_v11, 0.0 }
 0x8a3   :  { %1031 = vadd.xlane.f32.xlu0 %v1030_v12 }
 0x90e   :  { %v1029_v13 = vpop.xlane.xlu2 %1028 }
 0x90f   :  { %v1033_v50 = vmul.f32 %v1029_v13, %v2507_v10 }
 0x911   :  { %v1035_v15 = vadd.f32 1e-12, %v1033_v50 }
 0x913   :  { %2334 = vrsqrt.f32 %v1035_v15  ;;  %vm1043_vm13 = vweird.f32 %v1035_v15 }
 0x916   :  { %v1032_v18 = vpop.xlane.xlu0 %1031 }
 0x917   :  { %v1034_v21 = vmul.f32 %v1032_v18, %v2507_v10 }
 0x919   :  { %v2335_v22 = vpop.eup %2334  ;;  %v1036_v23 = vadd.f32 1e-12, %v1034_v21 }
 0x91a   :  { %v1038_v24 = vmul.f32 %v2335_v22, %v1035_v15  ;;  %vm1044_vm12 = vweird.f32 %v2335_v22 }
 0x91b   :  { %2336 = vrsqrt.f32 %v1036_v23  ;;  %vm1045_vm14 = vmor %vm1043_vm13, %vm1044_vm12  ;;  %vm1053_vm3 = vweird.f32 %v1036_v23 }
 0x91c   :  { %v1039_v20 = vmul.f32 %v2335_v22, %v1038_v24 }
 0x91e   :  { %v1040_v25 = vmul.f32 0.5, %v1039_v20 }
 0x920   :  { %v1041_v0 = vsub.f32 1.5, %v1040_v25 }
 0x921   :  { %v2337_v27 = vpop.eup %2336 }
 0x922   :  { %v1042_v28 = vmul.f32 %v2335_v22, %v1041_v0  ;;  %v1048_v3 = vmul.f32 %v2337_v27, %v1036_v23  ;;  %vm1054_vm15 = vweird.f32 %v2337_v27  ;;  %v2382_v0 = vld [vmem:[%s3092_s1] ss:$0 sm:$0xff] }
 0x923   :  { %vm1055_vm4 = vmor %vm1053_vm3, %vm1054_vm15 }
 0x924   :  { %v1046_v31 = vsel %vm1045_vm14, %v2335_v22, %v1042_v28  ;;  %v1049_v32 = vmul.f32 %v2337_v27, %v1048_v3 }
 0x925   :  { %v1057_v19 = vmul.f32 %v1046_v31, %v1023_v1 }
 0x926   :  { %v1050_v34 = vmul.f32 0.5, %v1049_v32 }
 0x927   :  { %v1062_v35 = vmul.f32 %v2277_v29, %v1057_v19 }
 0x928   :  { %v1051_v37 = vsub.f32 1.5, %v1050_v34 }
 0x929   :  { %v2796_v38 = vadd.f32 %v2278_v33, %v1062_v35 }
 0x92a   :  { %v1052_v39 = vmul.f32 %v2337_v27, %v1051_v37  ;;  %v2383_v37 = vld [vmem:[%s3092_s1 + $0x1] ss:$0 sm:$0xff] }
 0x92b   :  { %v1069_v40 = vsel %vm74_vm0, %v2796_v38, 0.0 }
 0x92c   :  { %2099 = vst [vmem:[%s3091_s18 + $0x10] sm:$0xff] %v1069_v40  ;;  %v1056_v41 = vsel %vm1055_vm4, %v2337_v27, %v1052_v39 }
 0x92d   :  { %v1058_v42 = vmul.f32 %v1056_v41, %v1024_v8 }
 0x92f   :  { %v1063_v30 = vmul.f32 %v2277_v29, %v1058_v42 }
 0x931   :  { %v2803_v9 = vadd.f32 %v2278_v33, %v1063_v30 }
 0x933   :  { %v1070_v46 = vsel %vm74_vm0, %v2803_v9, 0.0  ;;  %v1074_v26 = vpack.c.bf16 %v2803_v9, %v2796_v38 }
 0x934   :  { %2100 = vst [vmem:[%s3091_s18 + $0x18] sm:$0xff] %v1070_v46 }
 0x935   :  { %2114 = vmatmul.msk.bf16.vlgmr.msrb.gmra.mxu0 %vm74_vm0, %v1074_v26 }
 0x9b2   :  { %v1109_v6 = vpop.f32.mrf.mxu0 }
 0x9b3   :  { %v1110_v44 = vadd.f32 %v2279_v43, %v1109_v6 }
 0x9b5   :  { %v1114_v16 = vpack.c.bf16 %v1110_v44, %v1110_v44  ;;  %v2384_v44 = vld [vmem:[%s3092_s1 + $0x2] ss:$0 sm:$0xff] }
 0x9b7   :  { %1118 = vrot.lane.b32.xlu1 %v1114_v16, %s2392_s24  ;;  %v1130_v55 = vunpack.c.l.b16 %v1114_v16 }
 0x9b9   :  { %v2823_v57 = vpack.c.b16 %v1130_v55, %v1130_v55  ;;  %v2385_v55 = vld [vmem:[%s3092_s1 + $0x4] ss:$0 sm:$0xff] }
 0x9ba   :  { %v1111_v47 = vpop.f32.mrf.mxu0 }
 0x9bb   :  { %v1112_v48 = vadd.f32 %v2279_v43, %v1111_v47 }
 0x9bd   :  { %v1115_v49 = vpack.c.bf16 %v1112_v48, %v1112_v48 }
 0x9bf   :  { %1124 = vrot.lane.b32.xlu0 %v1115_v49, %s2393_s25  ;;  %1120 = vrot.lane.b32.xlu2 %v1115_v49, %s2392_s24  ;;  %v1153_v52 = vunpack.c.l.b16 %v1115_v49 }
 0x9c0   :  { %1126 = vrot.lane.b32.xlu1 %v1114_v16, %s2391_s23 }
 0x9c1   :  { %v1154_v54 = vpack.c.b16 %v1153_v52, %v1153_v52 }
 0x9c7   :  { %1128 = vrot.lane.b32.xlu2 %v1115_v49, %s2391_s23  ;;  %1122 = vrot.lane.b32.xlu0 %v1114_v16, %s2393_s25  ;;  %s3121_s23 = smov 24  }
 0x9c8   :  { %1155 = vrot.lane.b32.xlu1 %v1154_v54, %s2394_s5 }
 0x9cf   :  { %1132 = vrot.lane.b32.xlu2 %v2823_v57, %s2394_s5 }
 0xa19   :  { %v1121_v45 = vpop.permute.xlu2 %1120 }
 0xa1a   :  { %v1199_v58 = vunpack.c.l.b16 %v1121_v45 }
 0xa1c   :  { %v2827_v59 = vpack.c.b16 %v1199_v58, %v1199_v58 }
 0xa1e   :  { %1201 = vrot.lane.b32.xlu1 %v2827_v59, %s2394_s5 }
 0xa21   :  { %v1129_v60 = vpop.permute.xlu2 %1128 }
 0xa22   :  { %v1291_v7 = vunpack.c.l.b16 %v1129_v60 }
 0xa24   :  { %v2846_v14 = vpack.c.b16 %v1291_v7, %v1291_v7 }
 0xa29   :  { %v1119_v51 = vpop.permute.xlu1 %1118  ;;  %v1133_v56 = vpop.permute.xlu2 %1132 }
 0xa2a   :  { %v1176_v61 = vunpack.c.l.b16 %v1119_v51  ;;  %v1138_v36 = vsel %vm222_vm8, %v1133_v56, 0  ;;  %v2386_v56 = vld [vmem:[%s3092_s1 + $0x5] ss:$0 sm:$0xff] }
 0xa2b   :  { %1147 = vmatpush.bf16.xpose.msrb.mxu1 %v1138_v36 }
 0xa2c   :  { %v2832_v62 = vpack.c.b16 %v1176_v61, %v1176_v61 }
 0xa2e   :  { %1178 = vrot.lane.b32.xlu0 %v2832_v62, %s2394_s5 }
 0xa31   :  { %v1125_v53 = vpop.permute.xlu0 %1124 }
 0xa32   :  { %v1245_v63 = vunpack.c.l.b16 %v1125_v53  ;;  %v1127_v1 = vpop.permute.xlu1 %1126  ;;  %2115 = vmatmul.msk.bf16.vlgmr.msrb.gmra.mxu1 %vm222_vm8, %v1114_v16 }
 0xa33   :  { %v1268_v2 = vunpack.c.l.b16 %v1127_v1 }
 0xa34   :  { %v2837_v4 = vpack.c.b16 %v1245_v63, %v1245_v63  ;;  %v2387_v63 = vld [vmem:[%s3092_s1 + $0x3] ss:$0 sm:$0xff] }
 0xa35   :  { %v2839_v5 = vpack.c.b16 %v1268_v2, %v1268_v2  ;;  %v2388_v2 = vld [vmem:[%s3092_s1 + $0x6] ss:$0 sm:$0xff] }
 0xa36   :  { %1247 = vrot.lane.b32.xlu0 %v2837_v4, %s2394_s5 }
 0xa37   :  { %1270 = vrot.lane.b32.xlu2 %v2839_v5, %s2394_s5 }
 0xa39   :  { %v1123_v8 = vpop.permute.xlu0 %1122 }
 0xa3a   :  { %v1222_v11 = vunpack.c.l.b16 %v1123_v8  ;;  %v1156_v12 = vpop.permute.xlu1 %1155 }
 0xa3b   :  { %v1161_v13 = vsel %vm222_vm8, %v1156_v12, 0 }
 0xa3c   :  { %v2848_v50 = vpack.c.b16 %v1222_v11, %v1222_v11  ;;  %1170 = vmatpush.bf16.xpose.msrb.mxu2 %v1161_v13 }
 0xa3e   :  { %1224 = vrot.lane.b32.xlu1 %v2848_v50, %s2394_s5  ;;  %1293 = vrot.lane.b32.xlu0 %v2846_v14, %s2394_s5 }
 0xa43   :  { %2116 = vmatmul.msk.bf16.vlgmr.msrb.gmra.mxu2 %vm222_vm8, %v1115_v49 }
 0xa46   :  { %1535 = vrot.lane.b32.xlu0 %v1154_v54, %s2395_s26 }
 0xa90   :  { %v1202_v15 = vpop.permute.xlu1 %1201 }
 0xa91   :  { %v1207_v17 = vsel %vm222_vm8, %v1202_v15, 0  ;;  %v1271_v18 = vpop.permute.xlu2 %1270 }
 0xa92   :  { %1216 = vmatpush.bf16.xpose.msra.mxu0 %v1207_v17  ;;  %v1276_v23 = vsel %vm222_vm8, %v1271_v18, 0  ;;  %v2389_v17 = vld [vmem:[%s3092_s1 + $0x7] ss:$0 sm:$0xff]  ;;  %s3119_s1 = smov 16  }
 0xa99   :  { %2118 = vmatmul.msk.bf16.vlgmr.msra.gmra.mxu0 %vm222_vm8, %v1121_v45 }
 0xaa0   :  { %v1179_v21 = vpop.permute.xlu0 %1178 }
 0xaa1   :  { %v1184_v22 = vsel %vm222_vm8, %v1179_v21, 0 }
 0xaa2   :  { %1193 = vmatpush.bf16.xpose.msrb.mxu3 %v1184_v22 }
 0xaa8   :  { %v1248_v24 = vpop.permute.xlu0 %1247 }
 0xaa9   :  { %v1253_v20 = vsel %vm222_vm8, %v1248_v24, 0  ;;  %2117 = vmatmul.msk.bf16.vlgmr.msrb.gmra.mxu3 %vm222_vm8, %v1119_v51 }
 0xaaa   :  { %1285 = vmatpush.bf16.xpose.msra.mxu3 %v1276_v23  ;;  %1262 = vmatpush.bf16.xpose.msra.mxu2 %v1253_v20 }
 0xaaf   :  { %v1149_v25 = vpop.f32.mrf.mxu1 }
 0xab0   :  { %v1150_v27 = vadd.f32 %v2382_v0, %v1149_v25  ;;  %v1294_v28 = vpop.permute.xlu0 %1293  ;;  %v1225_v3 = vpop.permute.xlu1 %1224 }
 0xab1   :  { %v1299_v29 = vsel %vm222_vm8, %v1294_v28, 0  ;;  %v1230_v31 = vsel %vm222_vm8, %v1225_v3, 0  ;;  %2120 = vmatmul.msk.bf16.vlgmr.msra.gmra.mxu2 %vm222_vm8, %v1125_v53 }
 0xab2   :  { %1239 = vmatpush.bf16.xpose.msra.mxu1 %v1230_v31  ;;  %1308 = vmatpush.bf16.xpose.msrb.mxu0 %v1299_v29  ;;  %v1314_v32 = vsel %vm222_vm8, %v1150_v27, -inf }
 0xab3   :  { %1315 = vmax.xlane.f32.xlu0 %v1314_v32 }
 0xab7   :  { %v1151_v33 = vpop.f32.mrf.mxu1 }
 0xab8   :  { %v1536_v19 = vpop.permute.xlu0 %1535 }
 0xab9   :  { %v1541_v34 = vsel %vm608_vm9, %v1536_v19, 0  ;;  %2119 = vmatmul.msk.bf16.vlgmr.msra.gmra.mxu1 %vm222_vm8, %v1123_v8  ;;  %2121 = vmatmul.msk.bf16.vlgmr.msra.gmra.mxu3 %vm222_vm8, %v1127_v1 }
 0xaba   :  { %2122 = vmatmul.msk.bf16.vlgmr.msrb.gmra.mxu0 %vm222_vm8, %v1129_v60  ;;  %1550 = vmatpush.bf16.msrb.mxu2 %v1541_v34 }
 0xac6   :  { %v1172_v35 = vpop.f32.mrf.mxu2 }
 0xac7   :  { %v1173_v39 = vadd.f32 %v2383_v37, %v1172_v35 }
 0xac9   :  { %v1317_v40 = vsel %vm222_vm8, %v1173_v39, -inf }
 0xaca   :  { %1318 = vmax.xlane.f32.xlu2 %v1317_v40 }
 0xace   :  { %v1174_v41 = vpop.f32.mrf.mxu2 }
 0xb16   :  { %v1218_v42 = vpop.f32.mrf.mxu0 }
 0xb17   :  { %v1219_v1 = vadd.f32 %v2387_v63, %v1218_v42 }
 0xb19   :  { %v1323_v15 = vsel %vm222_vm8, %v1219_v1, -inf }
 0xb1e   :  { %v1220_v30 = vpop.f32.mrf.mxu0 }
 0xb26   :  { %v1316_v46 = vpop.xlane.xlu0 %1315 }
 0xb27   :  { %v1338_v26 = vsub.f32 %v1150_v27, %v1316_v46 }
 0xb29   :  { %v1346_v43 = vmul.f32 1.442695, %v1338_v26 }
 0xb2b   :  { %2338 = vpow2.f32 %v1346_v43 }
 0xb2c   :  { %v1195_v6 = vpop.f32.mrf.mxu3 }
 0xb2d   :  { %v1196_v16 = vadd.f32 %v2384_v44, %v1195_v6 }
 0xb2f   :  { %v1320_v47 = vsel %vm222_vm8, %v1196_v16, -inf }
 0xb30   :  { %1321 = vmax.xlane.f32.xlu1 %v1320_v47 }
 0xb31   :  { %v2881_v48 = vpop.eup %2338 }
 0xb32   :  { %v1362_v60 = vsel %vm222_vm8, %v2881_v48, 0.0 }
 0xb34   :  { %v1197_v49 = vpop.f32.mrf.mxu3  ;;  %v1264_v52 = vpop.f32.mrf.mxu2 }
 0xb35   :  { %v1265_v61 = vadd.f32 %v2386_v56, %v1264_v52 }
 0xb36   :  { %v1241_v54 = vpop.f32.mrf.mxu1 }
 0xb37   :  { %v1242_v45 = vadd.f32 %v2385_v55, %v1241_v54  ;;  %v1310_v58 = vpop.f32.mrf.mxu0  ;;  %v1329_v12 = vsel %vm222_vm8, %v1265_v61, -inf }
 0xb38   :  { %1363 = vadd.xlane.f32.xlu1 %v1362_v60  ;;  %v1311_v18 = vadd.f32 %v2389_v17, %v1310_v58 }
 0xb39   :  { %v1326_v51 = vsel %vm222_vm8, %v1242_v45, -inf }
 0xb3a   :  { %1327 = vmax.xlane.f32.xlu2 %v1326_v51  ;;  %v1335_v22 = vsel %vm222_vm8, %v1311_v18, -inf }
 0xb3c   :  { %v1266_v36 = vpop.f32.mrf.mxu2  ;;  %v1287_v53 = vpop.f32.mrf.mxu3 }
 0xb3d   :  { %v1288_v7 = vadd.f32 %v2388_v2, %v1287_v53  ;;  %v1319_v23 = vpop.xlane.xlu2 %1318 }
 0xb3e   :  { %v1243_v8 = vpop.f32.mrf.mxu1  ;;  %v1339_v24 = vsub.f32 %v1173_v39, %v1319_v23 }
 0xb3f   :  { %v1312_v11 = vpop.f32.mrf.mxu0  ;;  %v1332_v13 = vsel %vm222_vm8, %v1288_v7, -inf }
 0xb40   :  { %1330 = vmax.xlane.f32.xlu1 %v1329_v12  ;;  %1333 = vmax.xlane.f32.xlu0 %v1332_v13  ;;  %v1348_v20 = vmul.f32 1.442695, %v1339_v24 }
 0xb42   :  { %1324 = vmax.xlane.f32.xlu2 %v1323_v15  ;;  %2340 = vpow2.f32 %v1348_v20 }
 0xb44   :  { %v1289_v21 = vpop.f32.mrf.mxu3 }
 0xb48   :  { %1336 = vmax.xlane.f32.xlu1 %v1335_v22  ;;  %v2909_v25 = vpop.eup %2340 }
 0xb49   :  { %v1365_v0 = vsel %vm222_vm8, %v2909_v25, 0.0 }
 0xb54   :  { %1514 = vrot.lane.b32.xlu0 %v2823_v57, %s2395_s26 }
 0xb5a   :  { %1556 = vrot.lane.b32.xlu2 %v2832_v62, %s2395_s26 }
 0xb7e   :  { %1366 = vadd.xlane.f32.xlu0 %v1365_v0 }
 0xba3   :  { %v1322_v27 = vpop.xlane.xlu1 %1321 }
 0xba4   :  { %v1340_v28 = vsub.f32 %v1196_v16, %v1322_v27 }
 0xba6   :  { %v1350_v3 = vmul.f32 1.442695, %v1340_v28 }
 0xba8   :  { %2342 = vpow2.f32 %v1350_v3 }
 0xbab   :  { %v1364_v29 = vpop.xlane.xlu1 %1363 }
 0xbac   :  { %2344 = vrcp.f32 %v1364_v29  ;;  %v1397_v52 = vand.u32 2147483648, %v1364_v29  ;;  %vm1391_vm6 = vweird.f32 %v1364_v29  ;;  %v1395_v55 = vand.u32 2147483647, %v1364_v29 }
 0xbad   :  { %v1328_v57 = vpop.xlane.xlu2 %1327 }
 0xbae   :  { %v2913_v31 = vpop.eup %2342  ;;  %v1342_v62 = vsub.f32 %v1242_v45, %v1328_v57  ;;  %v1398_v63 = vor.u32 1.1754944e-38, %v1397_v52  ;;  %vm1396_vm10 = vcmp.eq.f32.partialorder %v1395_v55, 8.507059e+37 }
 0xbaf   :  { %v1368_v32 = vsel %vm222_vm8, %v2913_v31, 0.0 }
 0xbb0   :  { %v1354_v33 = vmul.f32 1.442695, %v1342_v62  ;;  %1369 = vadd.xlane.f32.xlu2 %v1368_v32 }
 0xbb2   :  { %v2345_v19 = vpop.eup %2344  ;;  %2346 = vpow2.f32 %v1354_v33 }
 0xbb3   :  { %v1387_v34 = vmul.f32 %v2345_v19, %v1364_v29  ;;  %v1331_v35 = vpop.xlane.xlu1 %1330  ;;  %v1334_v37 = vpop.xlane.xlu0 %1333  ;;  %vm1392_vm5 = vweird.f32 %v2345_v19 }
 0xbb4   :  { %v1343_v39 = vsub.f32 %v1265_v61, %v1331_v35  ;;  %v1344_v40 = vsub.f32 %v1288_v7, %v1334_v37  ;;  %vm1393_vm7 = vmor %vm1391_vm6, %vm1392_vm5 }
 0xbb5   :  { %v1388_v41 = vsub.f32 1.0, %v1387_v34  ;;  %v1325_v42 = vpop.xlane.xlu2 %1324 }
 0xbb6   :  { %v1356_v30 = vmul.f32 1.442695, %v1343_v39  ;;  %v1358_v46 = vmul.f32 1.442695, %v1344_v40  ;;  %v1341_v26 = vsub.f32 %v1219_v1, %v1325_v42 }
 0xbb7   :  { %v1389_v43 = vmul.f32 %v2345_v19, %v1388_v41 }
 0xbb8   :  { %v2917_v6 = vpop.eup %2346  ;;  %2348 = vpow2.f32 %v1356_v30  ;;  %v1352_v44 = vmul.f32 1.442695, %v1341_v26 }
 0xbb9   :  { %2350 = vpow2.f32 %v1358_v46  ;;  %v1374_v16 = vsel %vm222_vm8, %v2917_v6, 0.0  ;;  %v1390_v47 = vadd.f32 %v2345_v19, %v1389_v43 }
 0xbba   :  { %2352 = vpow2.f32 %v1352_v44  ;;  %1375 = vadd.xlane.f32.xlu1 %v1374_v16 }
 0xbbb   :  { %v1337_v49 = vpop.xlane.xlu1 %1336  ;;  %v1394_v61 = vsel %vm1393_vm7, %v2345_v19, %v1390_v47 }
 0xbbc   :  { %v1345_v54 = vsub.f32 %v1311_v18, %v1337_v49  ;;  %v1399_v7 = vsel %vm1396_vm10, %v1398_v63, %v1394_v61 }
 0xbbd   :  { %v1557_v45 = vpop.permute.xlu2 %1556  ;;  %v1400_v8 = vmul.f32 %v2881_v48, %v1399_v7 }
 0xbbe   :  { %v2921_v58 = vpop.eup %2348  ;;  %v1360_v60 = vmul.f32 1.442695, %v1345_v54  ;;  %v1562_v51 = vsel %vm608_vm9, %v1557_v45, 0 }
 0xbbf   :  { %v2924_v56 = vpop.eup %2350  ;;  %1571 = vmatpush.bf16.msrb.mxu3 %v1562_v51  ;;  %v1377_v36 = vsel %vm222_vm8, %v2921_v58, 0.0  ;;  %v1506_v17 = vpack.c.bf16 %v1400_v8, %v1400_v8 }
 0xbc0   :  { %v2928_v53 = vpop.eup %2352  ;;  %2354 = vpow2.f32 %v1360_v60  ;;  %1378 = vadd.xlane.f32.xlu2 %v1377_v36  ;;  %v1380_v1 = vsel %vm222_vm8, %v2924_v56, 0.0 }
 0xbc1   :  { %v1371_v2 = vsel %vm222_vm8, %v2928_v53, 0.0 }
 0xbc2   :  { %1381 = vadd.xlane.f32.xlu1 %v1380_v1  ;;  %1372 = vadd.xlane.f32.xlu0 %v1371_v2 }
 0xbc6   :  { %v2935_v11 = vpop.eup %2354  ;;  %v1515_v12 = vpop.permute.xlu0 %1514 }
 0xbc7   :  { %v1520_v13 = vsel %vm608_vm9, %v1515_v12, 0  ;;  %v1383_v15 = vsel %vm222_vm8, %v2935_v11, 0.0 }
 0xbc8   :  { %1529 = vmatpush.bf16.msrb.mxu1 %v1520_v13 }
 0xbca   :  { %1384 = vadd.xlane.f32.xlu1 %v1383_v15 }
 0xbcb   :  { %2123 = vmatmul.msk.bf16.vlgmr.msrb.gmra.mxu1 %vm222_vm8, %v1506_v17 }
 0xbd6   :  { %1640 = vrot.lane.b32.xlu0 %v2839_v5, %s2395_s26 }
 0xbd8   :  { %1619 = vrot.lane.b32.xlu2 %v2837_v4, %s2395_s26 }
 0xbde   :  { %1661 = vrot.lane.b32.xlu0 %v2846_v14, %s2395_s26 }
 0xbe0   :  { %1598 = vrot.lane.b32.xlu2 %v2848_v50, %s2395_s26 }
 0xbe3   :  { %1577 = vrot.lane.b32.xlu1 %v2827_v59, %s2395_s26  ;;  %s3120_s26 = smov 8  }
 0xbf1   :  { %v1367_v48 = vpop.xlane.xlu0 %1366 }
 0xbf2   :  { %2356 = vrcp.f32 %v1367_v48  ;;  %v1412_v23 = vand.u32 2147483648, %v1367_v48  ;;  %v1410_v5 = vand.u32 2147483647, %v1367_v48  ;;  %vm1406_vm13 = vweird.f32 %v1367_v48 }
 0xbf4   :  { %v1413_v4 = vor.u32 1.1754944e-38, %v1412_v23  ;;  %vm1411_vm15 = vcmp.eq.f32.partialorder %v1410_v5, 8.507059e+37 }
 0xbf8   :  { %v2357_v18 = vpop.eup %2356 }
 0xbf9   :  { %v1402_v21 = vmul.f32 %v2357_v18, %v1367_v48  ;;  %vm1407_vm12 = vweird.f32 %v2357_v18 }
 0xbfa   :  { %vm1408_vm14 = vmor %vm1406_vm13, %vm1407_vm12 }
 0xbfb   :  { %v1403_v22 = vsub.f32 1.0, %v1402_v21 }
 0xbfd   :  { %v1404_v24 = vmul.f32 %v2357_v18, %v1403_v22 }
 0xbff   :  { %v1405_v20 = vadd.f32 %v2357_v18, %v1404_v24 }
 0xc01   :  { %v1409_v14 = vsel %vm1408_vm14, %v2357_v18, %v1405_v20 }
 0xc02   :  { %v1414_v0 = vsel %vm1411_vm15, %v1413_v4, %v1409_v14 }
 0xc03   :  { %v1415_v50 = vmul.f32 %v2909_v25, %v1414_v0 }
 0xc05   :  { %v1507_v27 = vpack.c.bf16 %v1415_v50, %v1415_v50 }
 0xc07   :  { %2124 = vmatmul.msk.bf16.vlgmr.msrb.gmra.mxu2 %vm222_vm8, %v1507_v27 }
 0xc23   :  { %v1370_v59 = vpop.xlane.xlu2 %1369 }
 0xc24   :  { %2358 = vrcp.f32 %v1370_v59  ;;  %v1427_v62 = vand.u32 2147483648, %v1370_v59  ;;  %v1425_v33 = vand.u32 2147483647, %v1370_v59  ;;  %vm1421_vm4 = vweird.f32 %v1370_v59 }
 0xc26   :  { %v1428_v34 = vor.u32 1.1754944e-38, %v1427_v62  ;;  %vm1426_vm6 = vcmp.eq.f32.partialorder %v1425_v33, 8.507059e+37 }
 0xc2a   :  { %v2359_v28 = vpop.eup %2358 }
 0xc2b   :  { %v1417_v3 = vmul.f32 %v2359_v28, %v1370_v59  ;;  %vm1422_vm3 = vweird.f32 %v2359_v28 }
 0xc2c   :  { %vm1423_vm5 = vmor %vm1421_vm4, %vm1422_vm3 }
 0xc2d   :  { %v1418_v29 = vsub.f32 1.0, %v1417_v3  ;;  %v1376_v57 = vpop.xlane.xlu1 %1375 }
 0xc2e   :  { %2360 = vrcp.f32 %v1376_v57  ;;  %v1457_v43 = vand.u32 2147483648, %v1376_v57  ;;  %v1455_v47 = vand.u32 2147483647, %v1376_v57  ;;  %vm1451_vm10 = vweird.f32 %v1376_v57 }
 0xc2f   :  { %v1419_v32 = vmul.f32 %v2359_v28, %v1418_v29 }
 0xc30   :  { %v1458_v51 = vor.u32 1.1754944e-38, %v1457_v43  ;;  %vm1456_vm13 = vcmp.eq.f32.partialorder %v1455_v47, 8.507059e+37 }
 0xc31   :  { %v1420_v19 = vadd.f32 %v2359_v28, %v1419_v32 }
 0xc33   :  { %v1424_v35 = vsel %vm1423_vm5, %v2359_v28, %v1420_v19  ;;  %v1379_v25 = vpop.xlane.xlu2 %1378 }
 0xc34   :  { %v2361_v37 = vpop.eup %2360  ;;  %v1429_v39 = vsel %vm1426_vm6, %v1428_v34, %v1424_v35  ;;  %2362 = vrcp.f32 %v1379_v25  ;;  %v1470_v63 = vand.u32 2147483647, %v1379_v25  ;;  %v1472_v1 = vand.u32 2147483648, %v1379_v25 }
 0xc35   :  { %v1430_v40 = vmul.f32 %v2913_v31, %v1429_v39  ;;  %v1447_v41 = vmul.f32 %v2361_v37, %v1376_v57  ;;  %v1382_v42 = vpop.xlane.xlu1 %1381  ;;  %v2954_v30 = vpop.xlane.xlu0 %1372  ;;  %vm1452_vm7 = vweird.f32 %v2361_v37  ;;  %vm1466_vm15 = vweird.f32 %v1379_v25 }
 0xc36   :  { %2364 = vrcp.f32 %v1382_v42  ;;  %vm1453_vm12 = vmor %vm1451_vm10, %vm1452_vm7  ;;  %v1487_v13 = vand.u32 2147483648, %v1382_v42  ;;  %v1485_v48 = vand.u32 2147483647, %v1382_v42  ;;  %v1473_v21 = vor.u32 1.1754944e-38, %v1472_v1 }
 0xc37   :  { %v1448_v46 = vsub.f32 1.0, %v1447_v41  ;;  %2366 = vrcp.f32 %v2954_v30  ;;  %v1508_v44 = vpack.c.bf16 %v1430_v40, %v1430_v40  ;;  %vm1471_vm5 = vcmp.eq.f32.partialorder %v1470_v63, 8.507059e+37 }
 0xc38   :  { %vm1481_vm6 = vweird.f32 %v1382_v42  ;;  %v1488_v14 = vor.u32 1.1754944e-38, %v1487_v13  ;;  %vm1486_vm10 = vcmp.eq.f32.partialorder %v1485_v48, 8.507059e+37  ;;  %v1442_v19 = vand.u32 2147483648, %v2954_v30 }
 0xc39   :  { %v1449_v26 = vmul.f32 %v2361_v37, %v1448_v46  ;;  %2125 = vmatmul.msk.bf16.vlgmr.msrb.gmra.mxu3 %vm222_vm8, %v1508_v44 }
 0xc3a   :  { %v2363_v16 = vpop.eup %2362 }
 0xc3b   :  { %v1450_v49 = vadd.f32 %v2361_v37, %v1449_v26  ;;  %v1462_v52 = vmul.f32 %v2363_v16, %v1379_v25  ;;  %v1620_v31 = vpop.permute.xlu2 %1619  ;;  %vm1467_vm14 = vweird.f32 %v2363_v16 }
 0xc3c   :  { %v2365_v54 = vpop.eup %2364  ;;  %v1625_v55 = vsel %vm608_vm9, %v1620_v31, 0  ;;  %vm1468_vm4 = vmor %vm1466_vm15, %vm1467_vm14 }
 0xc3d   :  { %v2959_v45 = vpop.eup %2366  ;;  %v1454_v60 = vsel %vm1453_vm12, %v2361_v37, %v1450_v49  ;;  %v1463_v61 = vsub.f32 1.0, %v1462_v52  ;;  %v1477_v36 = vmul.f32 %v2365_v54, %v1382_v42  ;;  %1634 = vmatpush.bf16.msra.mxu2 %v1625_v55  ;;  %vm1482_vm3 = vweird.f32 %v2365_v54  ;;  %v1385_v23 = vpop.xlane.xlu1 %1384 }
 0xc3e   :  { %v1432_v2 = vmul.f32 %v2959_v45, %v2954_v30  ;;  %v1459_v7 = vsel %vm1456_vm13, %v1458_v51, %v1454_v60  ;;  %vm1483_vm7 = vmor %vm1481_vm6, %vm1482_vm3  ;;  %2368 = vrcp.f32 %v1385_v23  ;;  %vm1437_vm12 = vweird.f32 %v2959_v45 }
 0xc3f   :  { %v1464_v8 = vmul.f32 %v2363_v16, %v1463_v61  ;;  %v1478_v12 = vsub.f32 1.0, %v1477_v36  ;;  %v1460_v18 = vmul.f32 %v2917_v6, %v1459_v7  ;;  %vm1436_vm13 = vweird.f32 %v2954_v30 }
 0xc40   :  { %v1433_v22 = vsub.f32 1.0, %v1432_v2  ;;  %vm1438_vm14 = vmor %vm1436_vm13, %vm1437_vm12  ;;  %v1443_v37 = vor.u32 1.1754944e-38, %v1442_v19  ;;  %v1502_v49 = vand.u32 2147483648, %v1385_v23  ;;  %v1500_v52 = vand.u32 2147483647, %v1385_v23 }
 0xc41   :  { %v1465_v15 = vadd.f32 %v2363_v16, %v1464_v8  ;;  %v1479_v17 = vmul.f32 %v2365_v54, %v1478_v12  ;;  %v1510_v28 = vpack.c.bf16 %v1460_v18, %v1460_v18 }
 0xc42   :  { %v1434_v59 = vmul.f32 %v2959_v45, %v1433_v22  ;;  %vm1501_vm6 = vcmp.eq.f32.partialorder %v1500_v52, 8.507059e+37  ;;  %v2213_v22 = vld [vmem:[%s3094_s6 + $0x18] sm:$0xff] }
 0xc43   :  { %v1469_v24 = vsel %vm1468_vm4, %v2363_v16, %v1465_v15  ;;  %v1480_v5 = vadd.f32 %v2365_v54, %v1479_v17  ;;  %v1599_v20 = vpop.permute.xlu2 %1598  ;;  %vm1496_vm4 = vweird.f32 %v1385_v23 }
 0xc44   :  { %v1474_v4 = vsel %vm1471_vm5, %v1473_v21, %v1469_v24  ;;  %v1604_v0 = vsel %vm608_vm9, %v1599_v20, 0  ;;  %v2369_v33 = vpop.eup %2368 }
 0xc45   :  { %v1475_v50 = vmul.f32 %v2921_v58, %v1474_v4  ;;  %v1484_v27 = vsel %vm1483_vm7, %v2365_v54, %v1480_v5  ;;  %1613 = vmatpush.bf16.msra.mxu1 %v1604_v0  ;;  %v1435_v58 = vadd.f32 %v2959_v45, %v1434_v59  ;;  %v1492_v25 = vmul.f32 %v2369_v33, %v1385_v23  ;;  %v2212_v23 = vld [vmem:[%s3094_s6 + $0x10] sm:$0xff] }
 0xc46   :  { %v1489_v6 = vsel %vm1486_vm10, %v1488_v14, %v1484_v27  ;;  %vm1497_vm3 = vweird.f32 %v2369_v33 }
 0xc47   :  { %v1490_v3 = vmul.f32 %v2924_v56, %v1489_v6  ;;  %v1511_v29 = vpack.c.bf16 %v1475_v50, %v1475_v50  ;;  %v1440_v56 = vand.u32 2147483647, %v2954_v30  ;;  %v1439_v35 = vsel %vm1438_vm14, %v2959_v45, %v1435_v58  ;;  %vm1498_vm5 = vmor %vm1496_vm4, %vm1497_vm3 }
 0xc48   :  { %v2968_v57 = vpop.f32.mrf.mxu1  ;;  %v1641_v62 = vpop.permute.xlu0 %1640  ;;  %2127 = vmatmul.msk.bf16.vlgmr.msra.gmra.mxu1 %vm222_vm8, %v1510_v28  ;;  %v1493_v41 = vsub.f32 1.0, %v1492_v25 }
 0xc49   :  { %v1646_v32 = vsel %vm608_vm9, %v1641_v62, 0  ;;  %2128 = vmatmul.msk.bf16.vlgmr.msra.gmra.mxu2 %vm222_vm8, %v1511_v29  ;;  %v1512_v34 = vpack.c.bf16 %v1490_v3, %v1490_v3  ;;  %vm1441_vm15 = vcmp.eq.f32.partialorder %v1440_v56, 8.507059e+37  ;;  %1744 = vmatpush.bf16.msrb.mxu1 %v2213_v22 }
 0xc4a   :  { %1655 = vmatpush.bf16.msra.mxu3 %v1646_v32  ;;  %v1444_v40 = vsel %vm1441_vm15, %v1443_v37, %v1439_v35  ;;  %v1494_v43 = vmul.f32 %v2369_v33, %v1493_v41 }
 0xc4b   :  { %v1445_v42 = vmul.f32 %v2928_v53, %v1444_v40  ;;  %v1503_v53 = vor.u32 1.1754944e-38, %v1502_v49 }
 0xc4c   :  { %v1495_v47 = vadd.f32 %v2369_v33, %v1494_v43 }
 0xc4d   :  { %2129 = vmatmul.msk.bf16.vlgmr.msra.gmra.mxu3 %vm222_vm8, %v1512_v34  ;;  %v1509_v16 = vpack.c.bf16 %v1445_v42, %v1445_v42  ;;  %1745 = vmatpush.bf16.msrb.mxu1 %v2212_v23 }
 0xc4e   :  { %v1499_v31 = vsel %vm1498_vm5, %v2369_v33, %v1495_v47  ;;  %v2280_v33 = vld [vmem:[%s3093_s7 + $0x1] ss:$0 sm:$0xff]  ;;  %v2215_v47 = vld [vmem:[%s3098_s10 + $0x18] sm:$0xff] }
 0xc4f   :  { %v1504_v54 = vsel %vm1501_vm6, %v1503_v53, %v1499_v31  ;;  %1844 = vmatpush.bf16.msrb.mxu2 %v2215_v47  ;;  %v2214_v31 = vld [vmem:[%s3098_s10 + $0x10] sm:$0xff] }
 0xc50   :  { %v1533_v39 = vpop.f32.mrf.mxu1  ;;  %v1662_v46 = vpop.permute.xlu0 %1661  ;;  %v1505_v55 = vmul.f32 %v2935_v11, %v1504_v54 }
 0xc51   :  { %v1667_v30 = vsel %vm608_vm9, %v1662_v46, 0 }
 0xc52   :  { %v1513_v45 = vpack.c.bf16 %v1505_v55, %v1505_v55 }
 0xc53   :  { %1845 = vmatpush.bf16.msrb.mxu2 %v2214_v31 }
 0xc55   :  { %v1578_v26 = vpop.permute.xlu1 %1577 }
 0xc56   :  { %v1583_v44 = vsel %vm608_vm9, %v1578_v26, 0 }
 0xc57   :  { %1592 = vmatpush.bf16.msra.mxu0 %v1583_v44 }
 0xc5a   :  { %2126 = vmatmul.msk.bf16.vlgmr.msra.gmra.mxu0 %vm222_vm8, %v1509_v16 }
 0xc5b   :  { %1676 = vmatpush.bf16.msrb.mxu0 %v1667_v30 }
 0xc6a   :  { %2130 = vmatmul.msk.bf16.vlgmr.msrb.gmra.mxu0 %vm222_vm8, %v1513_v45 }
 0xc8a   :  { %v1552_v60 = vpop.f32.mrf.mxu2 }
 0xc92   :  { %v1554_v51 = vpop.f32.mrf.mxu2 }
 0xcbc   :  { %v1573_v61 = vpop.f32.mrf.mxu3 }
 0xcc4   :  { %v1575_v63 = vpop.f32.mrf.mxu3 }
 0xcc5   :  { %v1615_v36 = vpop.f32.mrf.mxu1 }
 0xccc   :  { %v1636_v1 = vpop.f32.mrf.mxu2 }
 0xccd   :  { %v2251_v2 = vpack.i.bf16 %v1636_v1, %v1615_v36  ;;  %v1617_v7 = vpop.f32.mrf.mxu1 }
 0xccf   :  { %2252 = vrot.lane.b32.xlu0 %v2251_v2, %s3119_s1 }
 0xcd0   :  { %v1657_v8 = vpop.f32.mrf.mxu3 }
 0xcd4   :  { %v1638_v12 = vpop.f32.mrf.mxu2 }
 0xcd7   :  { %v1594_v13 = vpop.f32.mrf.mxu0 }
 0xcd8   :  { %v2246_v15 = vpack.i.bf16 %v1594_v13, %v1573_v61  ;;  %v1659_v17 = vpop.f32.mrf.mxu3 }
 0xcda   :  { %2247 = vrot.lane.b32.xlu2 %v2246_v15, %s3120_s26  ;;  %v2281_v15 = vld [vmem:[%s3095_s8 + $0x1] ss:$0 sm:$0xff] }
 0xcdf   :  { %v1596_v11 = vpop.f32.mrf.mxu0 }
 0xce7   :  { %v1678_v48 = vpop.f32.mrf.mxu0 }
 0xce8   :  { %v2256_v18 = vpack.i.bf16 %v1678_v48, %v1657_v8 }
 0xcea   :  { %2257 = vrot.lane.b32.xlu1 %v2256_v18, %s3121_s23  ;;  %v2282_v18 = vld [vmem:[%s3096_s9 + $0x1] ss:$0 sm:$0xff] }
 0xcef   :  { %v1680_v21 = vpop.f32.mrf.mxu0 }
 0xd34   :  { %v2248_v24 = vpop.permute.xlu2 %2247 }
 0xd35   :  { %v2250_v20 = vunpack.i.h.bf16 %v2248_v24  ;;  %v2249_v4 = vunpack.i.l.bf16 %v2248_v24 }
 0xd37   :  { %v1707_v27 = vsel %vm222_vm8, %v1552_v60, %v2250_v20  ;;  %v1706_v6 = vsel %vm222_vm8, %v2968_v57, %v2249_v4  ;;  %v2219_v4 = vld [vmem:[%s3100_s12 + $0x38] sm:$0xff] }
 0xd38   :  { %1916 = vmatpush.bf16.msrb.mxu3 %v2219_v4  ;;  %v2285_v4 = vld [vmem:[%s3101_s14 + $0x1] ss:$0 sm:$0xff] }
 0xd41   :  { %v2253_v5 = vpop.permute.xlu0 %2252 }
 0xd42   :  { %v2255_v14 = vunpack.i.h.bf16 %v2253_v5  ;;  %v2254_v0 = vunpack.i.l.bf16 %v2253_v5 }
 0xd44   :  { %v1708_v3 = vsel %vm798_vm1, %v1706_v6, %v2254_v0  ;;  %v1709_v29 = vsel %vm798_vm1, %v1707_v27, %v2255_v14  ;;  %v2218_v14 = vld [vmem:[%s3100_s12 + $0x30] sm:$0xff]  ;;  %v2283_v0 = vld [vmem:[%s3097_s11 + $0x1] ss:$0 sm:$0xff] }
 0xd45   :  { %1917 = vmatpush.bf16.msrb.mxu3 %v2218_v14 }
 0xd5c   :  { %v2258_v50 = vpop.permute.xlu1 %2257 }
 0xd5d   :  { %v2260_v59 = vunpack.i.h.bf16 %v2258_v50  ;;  %v2259_v28 = vunpack.i.l.bf16 %v2258_v50  ;;  %v2217_v50 = vld [vmem:[%s3100_s12 + $0x28] sm:$0xff] }
 0xd5e   :  { %1918 = vmatpush.bf16.msrb.mxu3 %v2217_v50 }
 0xd5f   :  { %v1710_v62 = vsel %vm801_vm2, %v1708_v3, %v2259_v28  ;;  %v1711_v32 = vsel %vm801_vm2, %v1709_v29, %v2260_v59  ;;  %v2216_v59 = vld [vmem:[%s3100_s12 + $0x20] sm:$0xff] }
 0xd60   :  { %v1712_v58 = vpack.c.bf16 %v1711_v32, %v1710_v62 }
 0xd62   :  { %2144 = vmatmul.msk.bf16.vlgmr.msrb.gmra.mxu1 %vm74_vm0, %v1712_v58  ;;  %1919 = vmatpush.bf16.msrb.mxu3 %v2216_v59 }
 0xddf   :  { %v1747_v19 = vpop.f32.mrf.mxu1 }
 0xde0   :  { %v1748_v34 = vadd.f32 %v2280_v33, %v1747_v19 }
 0xde2   :  { %v1752_v57 = vadd.f32 %v1748_v34, %v2796_v38 }
 0xde4   :  { %v1758_v56 = vsel %vm74_vm0, %v1752_v57, 0.0 }
 0xde5   :  { %1759 = vadd.xlane.f32.xlu2 %v1758_v56 }
 0xde7   :  { %v1749_v35 = vpop.f32.mrf.mxu1 }
 0xde8   :  { %v1750_v25 = vadd.f32 %v2280_v33, %v1749_v35 }
 0xdea   :  { %v1753_v37 = vadd.f32 %v1750_v25, %v2803_v9 }
 0xdec   :  { %v1761_v39 = vsel %vm74_vm0, %v1753_v37, 0.0 }
 0xded   :  { %1762 = vadd.xlane.f32.xlu0 %v1761_v39 }
 0xe58   :  { %v1760_v40 = vpop.xlane.xlu2 %1759 }
 0xe59   :  { %v1764_v41 = vmul.f32 %v1760_v40, %v2507_v10 }
 0xe5b   :  { %v1766_v42 = vsub.f32 %v1752_v57, %v1764_v41 }
 0xe5d   :  { %v1768_v46 = vmul.f32 %v1766_v42, %v1766_v42 }
 0xe5f   :  { %v1770_v26 = vsel %vm74_vm0, %v1768_v46, 0.0 }
 0xe60   :  { %v1763_v43 = vpop.xlane.xlu0 %1762  ;;  %1771 = vadd.xlane.f32.xlu1 %v1770_v26 }
 0xe61   :  { %v1765_v38 = vmul.f32 %v1763_v43, %v2507_v10 }
 0xe63   :  { %v1767_v44 = vsub.f32 %v1753_v37, %v1765_v38  ;;  %v2284_v38 = vld [vmem:[%s3099_s13 + $0x1] ss:$0 sm:$0xff] }
 0xe65   :  { %v1769_v30 = vmul.f32 %v1767_v44, %v1767_v44 }
 0xe67   :  { %v1773_v16 = vsel %vm74_vm0, %v1769_v30, 0.0 }
 0xe68   :  { %1774 = vadd.xlane.f32.xlu2 %v1773_v16 }
 0xed3   :  { %v1772_v9 = vpop.xlane.xlu1 %1771 }
 0xed4   :  { %v1776_v49 = vmul.f32 %v1772_v9, %v2507_v10 }
 0xed6   :  { %v1778_v52 = vadd.f32 1e-12, %v1776_v49 }
 0xed8   :  { %2370 = vrsqrt.f32 %v1778_v52  ;;  %vm1786_vm9 = vweird.f32 %v1778_v52 }
 0xedb   :  { %v1775_v53 = vpop.xlane.xlu2 %1774 }
 0xedc   :  { %v1777_v54 = vmul.f32 %v1775_v53, %v2507_v10 }
 0xede   :  { %v2371_v55 = vpop.eup %2370  ;;  %v1779_v45 = vadd.f32 1e-12, %v1777_v54 }
 0xedf   :  { %v1781_v60 = vmul.f32 %v2371_v55, %v1778_v52  ;;  %vm1787_vm8 = vweird.f32 %v2371_v55 }
 0xee0   :  { %2372 = vrsqrt.f32 %v1779_v45  ;;  %vm1788_vm1 = vmor %vm1786_vm9, %vm1787_vm8  ;;  %vm1796_vm7 = vweird.f32 %v1779_v45 }
 0xee1   :  { %v1782_v51 = vmul.f32 %v2371_v55, %v1781_v60 }
 0xee3   :  { %v1783_v61 = vmul.f32 0.5, %v1782_v51 }
 0xee5   :  { %v1784_v36 = vsub.f32 1.5, %v1783_v61 }
 0xee6   :  { %v2373_v63 = vpop.eup %2372 }
 0xee7   :  { %v1785_v1 = vmul.f32 %v2371_v55, %v1784_v36  ;;  %v1791_v2 = vmul.f32 %v2373_v63, %v1779_v45  ;;  %vm1797_vm2 = vweird.f32 %v2373_v63 }
 0xee8   :  { %vm1798_vm10 = vmor %vm1796_vm7, %vm1797_vm2 }
 0xee9   :  { %v1792_v7 = vmul.f32 %v2373_v63, %v1791_v2  ;;  %v1789_v8 = vsel %vm1788_vm1, %v2371_v55, %v1785_v1 }
 0xeea   :  { %v1800_v17 = vmul.f32 %v1789_v8, %v1766_v42 }
 0xeeb   :  { %v1793_v12 = vmul.f32 0.5, %v1792_v7  ;;  %v2221_v7 = vld [vmem:[%s3104_s16 + $0x8] sm:$0xff] }
 0xeec   :  { %v1805_v21 = vmul.f32 %v2281_v15, %v1800_v17  ;;  %2021 = vmatpush.bf16.msra.mxu0 %v2221_v7 }
 0xeed   :  { %v1794_v13 = vsub.f32 1.5, %v1793_v12 }
 0xeee   :  { %v1810_v24 = vadd.f32 %v2282_v18, %v1805_v21 }
 0xeef   :  { %v1795_v11 = vmul.f32 %v2373_v63, %v1794_v13  ;;  %v2220_v13 = vld [vmem:[%s3104_s16] sm:$0xff] }
 0xef0   :  { %2022 = vmatpush.bf16.msra.mxu0 %v2220_v13 }
 0xef1   :  { %v1799_v48 = vsel %vm1798_vm10, %v2373_v63, %v1795_v11 }
 0xef2   :  { %v1801_v22 = vmul.f32 %v1799_v48, %v1767_v44 }
 0xef4   :  { %v1806_v23 = vmul.f32 %v2281_v15, %v1801_v22 }
 0xef6   :  { %v1811_v5 = vadd.f32 %v2282_v18, %v1806_v23 }
 0xef8   :  { %v1812_v20 = vpack.c.bf16 %v1811_v5, %v1810_v24 }
 0xefa   :  { %2160 = vmatmul.msk.bf16.vlgmr.msrb.gmra.mxu2 %vm74_vm0, %v1812_v20 }
 0xf7d   :  { %v1847_v27 = vpop.f32.mrf.mxu2 }
 0xf7e   :  { %v1848_v6 = vadd.f32 %v2283_v0, %v1847_v27 }
 0xf80   :  { %v1852_v28 = vmul.f32 %v1848_v6, %v1848_v6 }
 0xf82   :  { %v1854_v3 = vmul.f32 %v1852_v28, %v1848_v6 }
 0xf84   :  { %v1856_v29 = vmul.f32 0.044715, %v1854_v3 }
 0xf85   :  { %v1849_v62 = vpop.f32.mrf.mxu2 }
 0xf86   :  { %v1858_v32 = vadd.f32 %v1856_v29, %v1848_v6  ;;  %v1850_v58 = vadd.f32 %v2283_v0, %v1849_v62 }
 0xf88   :  { %v1860_v33 = vmul.f32 0.7978846, %v1858_v32  ;;  %v1853_v19 = vmul.f32 %v1850_v58, %v1850_v58 }
 0xf8a   :  { %v1855_v34 = vmul.f32 %v1853_v19, %v1850_v58  ;;  %2374 = vtanh.f32 %v1860_v33 }
 0xf8c   :  { %v1857_v57 = vmul.f32 0.044715, %v1855_v34 }
 0xf8e   :  { %v1859_v56 = vadd.f32 %v1857_v57, %v1850_v58  ;;  %v2287_v57 = vld [vmem:[%s3103_s17] ss:$0 sm:$0xff] }
 0xf90   :  { %v1861_v35 = vmul.f32 0.7978846, %v1859_v56  ;;  %v2375_v25 = vpop.eup %2374 }
 0xf91   :  { %v1864_v37 = vadd.f32 1.0, %v2375_v25 }
 0xf92   :  { %2376 = vtanh.f32 %v1861_v35 }
 0xf93   :  { %v1866_v40 = vmul.f32 0.5, %v1864_v37 }
 0xf95   :  { %v1868_v46 = vmul.f32 %v1866_v40, %v1848_v6 }
 0xf98   :  { %v2377_v39 = vpop.eup %2376 }
 0xf99   :  { %v1865_v41 = vadd.f32 1.0, %v2377_v39 }
 0xf9b   :  { %v1867_v42 = vmul.f32 0.5, %v1865_v41 }
 0xf9d   :  { %v1869_v26 = vmul.f32 %v1867_v42, %v1850_v58 }
 0xf9f   :  { %v1870_v43 = vpack.c.bf16 %v1869_v26, %v1868_v46 }
 0xfa1   :  { %2186 = vmatmul.msk.bf16.vlgmr.msrb.gmra.mxu3 %vm993_vm11, %v1870_v43 }
0x1024   :  { %v1921_v44 = vpop.f32.mrf.mxu3 }
0x1025   :  { %v1922_v30 = vadd.f32 %v2284_v38, %v1921_v44 }
0x1027   :  { %v1926_v16 = vadd.f32 %v1922_v30, %v1810_v24 }
0x1029   :  { %v1932_v9 = vsel %vm74_vm0, %v1926_v16, 0.0 }
0x102a   :  { %1933 = vadd.xlane.f32.xlu0 %v1932_v9 }
0x102c   :  { %v1923_v47 = vpop.f32.mrf.mxu3 }
0x102d   :  { %v1924_v49 = vadd.f32 %v2284_v38, %v1923_v47 }
0x102f   :  { %v1927_v52 = vadd.f32 %v1924_v49, %v1811_v5 }
0x1031   :  { %v1935_v31 = vsel %vm74_vm0, %v1927_v52, 0.0 }
0x1032   :  { %1936 = vadd.xlane.f32.xlu1 %v1935_v31 }
0x109d   :  { %v1934_v53 = vpop.xlane.xlu0 %1933 }
0x109e   :  { %v1938_v54 = vmul.f32 %v1934_v53, %v2507_v10 }
0x10a0   :  { %v1940_v55 = vsub.f32 %v1926_v16, %v1938_v54 }
0x10a2   :  { %v1942_v45 = vmul.f32 %v1940_v55, %v1940_v55 }
0x10a4   :  { %v1944_v60 = vsel %vm74_vm0, %v1942_v45, 0.0 }
0x10a5   :  { %v1937_v51 = vpop.xlane.xlu1 %1936  ;;  %1945 = vadd.xlane.f32.xlu2 %v1944_v60 }
0x10a6   :  { %v1939_v61 = vmul.f32 %v1937_v51, %v2507_v10 }
0x10a8   :  { %v1941_v36 = vsub.f32 %v1927_v52, %v1939_v61 }
0x10aa   :  { %v1943_v63 = vmul.f32 %v1941_v36, %v1941_v36 }
0x10ac   :  { %v1947_v1 = vsel %vm74_vm0, %v1943_v63, 0.0 }
0x10ad   :  { %1948 = vadd.xlane.f32.xlu0 %v1947_v1 }
0x1118   :  { %v1946_v2 = vpop.xlane.xlu2 %1945 }
0x1119   :  { %v1950_v8 = vmul.f32 %v1946_v2, %v2507_v10 }
0x111b   :  { %v1952_v12 = vadd.f32 1e-12, %v1950_v8 }
0x111d   :  { %2378 = vrsqrt.f32 %v1952_v12  ;;  %vm1960_vm12 = vweird.f32 %v1952_v12 }
0x1120   :  { %v1949_v15 = vpop.xlane.xlu0 %1948 }
0x1121   :  { %v1951_v17 = vmul.f32 %v1949_v15, %v2507_v10  ;;  %v2286_v10 = vld [vmem:[%s3102_s15 + $0x1] ss:$0 sm:$0xff] }
0x1123   :  { %v2379_v11 = vpop.eup %2378  ;;  %v1953_v48 = vadd.f32 1e-12, %v1951_v17 }
0x1124   :  { %v1955_v18 = vmul.f32 %v2379_v11, %v1952_v12  ;;  %vm1961_vm11 = vweird.f32 %v2379_v11 }
0x1125   :  { %2380 = vrsqrt.f32 %v1953_v48  ;;  %vm1962_vm13 = vmor %vm1960_vm12, %vm1961_vm11  ;;  %vm1970_vm15 = vweird.f32 %v1953_v48 }
0x1126   :  { %v1956_v21 = vmul.f32 %v2379_v11, %v1955_v18 }
0x1128   :  { %v1957_v22 = vmul.f32 0.5, %v1956_v21 }
0x112a   :  { %v1958_v23 = vsub.f32 1.5, %v1957_v22 }
0x112b   :  { %v2381_v24 = vpop.eup %2380 }
0x112c   :  { %v1959_v5 = vmul.f32 %v2379_v11, %v1958_v23  ;;  %v1965_v20 = vmul.f32 %v2381_v24, %v1953_v48  ;;  %vm1971_vm14 = vweird.f32 %v2381_v24 }
0x112d   :  { %vm1972_vm3 = vmor %vm1970_vm15, %vm1971_vm14 }
0x112e   :  { %v1963_v14 = vsel %vm1962_vm13, %v2379_v11, %v1959_v5  ;;  %v1966_v0 = vmul.f32 %v2381_v24, %v1965_v20 }
0x112f   :  { %v1974_v50 = vmul.f32 %v1963_v14, %v1940_v55 }
0x1130   :  { %v1967_v27 = vmul.f32 0.5, %v1966_v0 }
0x1131   :  { %v1979_v6 = vmul.f32 %v2285_v4, %v1974_v50 }
0x1132   :  { %v1968_v59 = vsub.f32 1.5, %v1967_v27 }
0x1133   :  { %v1984_v28 = vadd.f32 %v2286_v10, %v1979_v6 }
0x1134   :  { %v1969_v3 = vmul.f32 %v2381_v24, %v1968_v59 }
0x1135   :  { %v1986_v29 = vsel %vm74_vm0, %v1984_v28, 0.0 }
0x1136   :  { %2189 = vst [vmem:[%s3091_s18 + $0x20] sm:$0xff] %v1986_v29  ;;  %v1973_v62 = vsel %vm1972_vm3, %v2381_v24, %v1969_v3 }
0x1137   :  { %v1975_v32 = vmul.f32 %v1973_v62, %v1941_v36 }
0x1139   :  { %v1980_v58 = vmul.f32 %v2285_v4, %v1975_v32 }
0x113b   :  { %v1985_v33 = vadd.f32 %v2286_v10, %v1980_v58 }
0x113d   :  { %v1987_v19 = vsel %vm74_vm0, %v1985_v33, 0.0  ;;  %v1991_v34 = vpack.c.bf16 %v1985_v33, %v1984_v28 }
0x113e   :  { %2190 = vst [vmem:[%s3091_s18 + $0x28] sm:$0xff] %v1987_v19 }
0x113f   :  { %2199 = vmatmul.msk.bf16.vlgmr.msra.gmra.mxu0 %vm74_vm0, %v1991_v34 }
0x11bc   :  { %v2024_v56 = vpop.f32.mrf.mxu0 }
0x11bd   :  { %v2025_v35 = vadd.f32 %v2287_v57, %v2024_v56 }
0x11bf   :  { %2029 = vst [vmem:[%s3105_s19] sm:$0xff] %v2025_v35 }
0x11c4   :  { %v2026_v25 = vpop.f32.mrf.mxu0 }
0x11c5   :  { %v2027_v37 = vadd.f32 %v2287_v57, %v2026_v25 }
0x11c7   :  { %2030 = vst [vmem:[%s3105_s19 + $0x8] sm:$0xff] %v2027_v37 }

</bundles_post_ra>
